<compile_context>
chip_gen: v7x
topology: tpu7x:2x2x1
jax: 0.10.0
libtpu: 0.0.40
codegen_flags: <defaults>
</compile_context>

<pallas_src>
import math
from functools import partial

import jax
import jax.numpy as jnp
from jax.experimental import pallas as pl
from jax.experimental.pallas import tpu as pltpu


# ----------------------------------------------------------------------------
# RoPE helpers (plain JAX; tiny, computed once in the wrapper)
# ----------------------------------------------------------------------------
def rope_sin_cos(seq_len, dim):
    inv_freq = 1.0 / (10000.0 ** (jnp.arange(0, dim, 2, dtype=jnp.float32) / dim))
    t = jnp.arange(seq_len, dtype=jnp.float32)
    freqs = jnp.outer(t, inv_freq)                       # (S, dim/2)
    emb = jnp.concatenate([freqs, freqs], axis=-1)       # (S, dim)
    return jnp.sin(emb), jnp.cos(emb)


def rotate_half(v):
    h = v.shape[-1] // 2
    return jnp.concatenate([-v[..., h:], v[..., :h]], axis=-1)


# ----------------------------------------------------------------------------
# Pallas kernel: one (head, batch) latent-attention forward
# ----------------------------------------------------------------------------
def _mla_head_kernel(eps,
                     x_ref, wdkv_ref, gamma_ref, beta_ref, wkr_ref,
                     wqr_ref, bqr_ref, absorbed_ref, wuv_ref, wo_ref,
                     sin_ref, cos_ref, bias_ref,
                     out_ref, ckv_ref, kr_ref):
    cdt = x_ref.dtype
    x = x_ref[0]                                          # (S, D), compute dtype
    cos = cos_ref[...]
    sin_s = sin_ref[...]                                  # sign-folded sin (rotate_half)

    # latent down-projection + LayerNorm (f32 math, f32 accumulation on the MXU)
    c = jnp.dot(x, wdkv_ref[0], preferred_element_type=jnp.float32)      # (S, L)
    mu = jnp.mean(c, axis=-1, keepdims=True)
    var = jnp.mean((c - mu) ** 2, axis=-1, keepdims=True)
    nc = (c - mu) * jax.lax.rsqrt(var + eps)
    nc = nc * gamma_ref[0] + beta_ref[0]
    nc_c = nc.astype(cdt)

    D = x.shape[-1]
    L = c.shape[-1]

    # decoupled RoPE key: rotate_half via XLU lane-roll (no matmul)
    k = jnp.dot(x, wkr_ref[0], preferred_element_type=jnp.float32)       # (S, L)
    kr = k * cos + pltpu.roll(k, L // 2, 1) * sin_s

    # RoPE query from normalized latent (1/sqrt(2L) already folded into wqr/bqr)
    q = jnp.dot(nc_c, wqr_ref[0], preferred_element_type=jnp.float32) + bqr_ref[0]
    qr = q * cos + pltpu.roll(q, D // 2, 1) * sin_s

    # attention scores: score1 = (x @ absorbed_scaled) @ c_kv^T, score2 = q_r @ k_r^T
    xa = jnp.dot(x, absorbed_ref[0], preferred_element_type=jnp.float32)  # (S, L)
    dn = (((1,), (1,)), ((), ()))                         # contract last dims (A @ B^T)
    s1 = jax.lax.dot_general(xa.astype(cdt), nc_c, dn,
                             preferred_element_type=jnp.float32)
    s2 = jax.lax.dot_general(qr.astype(cdt), kr.astype(cdt), dn,
                             preferred_element_type=jnp.float32)
    scores = s1 + s2 + bias_ref[...]                      # precomputed causal bias

    # softmax (f32); reciprocal goes to the EUP slot
    m = jnp.max(scores, axis=-1, keepdims=True)
    e = jnp.exp(scores - m)
    w = e * pl.reciprocal(jnp.sum(e, axis=-1, keepdims=True), approx=True)

    # value = c_kv @ w_uv.weight (raw torch layout (L, D)), then per-head w_o
    value = jnp.dot(nc_c, wuv_ref[0], preferred_element_type=jnp.float32)  # (S, D)
    o = jnp.dot(w.astype(cdt), value.astype(cdt), preferred_element_type=jnp.float32)
    o = jnp.dot(o.astype(cdt), wo_ref[0], preferred_element_type=jnp.float32)

    out_ref[0, :, :] = o.astype(out_ref.dtype)
    ckv_ref[0, 0, :, :] = nc.astype(ckv_ref.dtype)
    kr_ref[0, 0, :, :] = kr.astype(kr_ref.dtype)


# ----------------------------------------------------------------------------
# Wrapper
# ----------------------------------------------------------------------------
def mla_forward(x, params, n_heads, kv_latent_dim, past_length=0):
    """x: (B, S, E). Compute dtype follows x.dtype (pass bf16 x + bf16 params
    for the fast path; matmul accumulation stays f32 inside the kernel)."""
    B, S, E = x.shape
    H = n_heads
    D = E // H
    L = kv_latent_dim
    assert D == L, "module's q_r @ k_r^T requires head_dim == kv_latent_dim"
    assert D % 2 == 0, "RoPE requires an even dimension"
    # column-blocked x/out BlockSpecs need a lane-aligned head dim
    assert D % 128 == 0, "head_dim must be a multiple of 128 for lane-dense blocking"
    cdt = x.dtype

    # RoPE tables: D == L so one pair serves both q and k; fold the rotate_half
    # sign into sin so the kernel only needs an XLU roll + two VPU multiplies.
    sin, cos = rope_sin_cos(S, D)
    sign = jnp.concatenate([-jnp.ones((D // 2,), jnp.float32),
                            jnp.ones((D // 2,), jnp.float32)])
    sin_signed = (sin * sign[None, :]).astype(cdt)
    cos = cos.astype(cdt)

    # causal mask as a precomputed additive bias (data, not code -> no recompile
    # when past_length changes, no per-step iota/compare/select)
    row = jnp.arange(S, dtype=jnp.int32)[:, None]
    col = jnp.arange(S, dtype=jnp.int32)[None, :]
    bias = jnp.where(col <= row + past_length, 0.0, -1e30).astype(jnp.float32)

    # fold the 1/sqrt(2L) score scale into the weights that feed the two score
    # matmuls (RoPE is linear, so scaling w_q_rope/b_q_rope scales q_r)
    scale = 1.0 / math.sqrt(L + L)
    wdkv = params["wdkv"].astype(cdt)
    gamma = params["gamma"].astype(cdt)
    beta = params["beta"].astype(cdt)
    wkr = params["wkr"].astype(cdt)
    wqr = (params["wqr"] * scale).astype(cdt)
    bqr = (params["bqr"] * scale).astype(cdt)
    absorbed = (params["absorbed"] * scale).astype(cdt)
    wuv = params["wuv"].astype(cdt)
    wo = params["wo"].astype(cdt)

    kernel = partial(_mla_head_kernel, 1e-5)

    def head_spec(shape):
        zeros = (0,) * len(shape)
        return pl.BlockSpec((1,) + shape, lambda h, b: (h,) + zeros)

    def shared_spec(shape):
        zeros = (0,) * len(shape)
        return pl.BlockSpec(shape, lambda h, b: zeros)

    in_specs = [
        # x stays (B, S, E); grab the head's contiguous column block directly.
        pl.BlockSpec((1, S, D), lambda h, b: (b, 0, h)),
        head_spec((D, L)),     # W_dkv^T
        head_spec((1, L)),     # LayerNorm gamma
        head_spec((1, L)),     # LayerNorm beta
        head_spec((D, L)),     # W_k_rope^T
        head_spec((L, D)),     # W_q_rope^T (pre-scaled)
        head_spec((1, D)),     # b_q_rope   (pre-scaled)
        head_spec((D, L)),     # absorbed_k (pre-scaled)
        head_spec((L, D)),     # w_uv.weight (raw torch layout)
        head_spec((D, D)),     # W_o^T (per-head)
        shared_spec((S, D)),   # sin (sign-folded)
        shared_spec((S, D)),   # cos
        shared_spec((S, S)),   # causal bias
    ]
    out_specs = [
        pl.BlockSpec((1, S, D), lambda h, b: (b, 0, h)),       # out column block
        pl.BlockSpec((1, 1, S, L), lambda h, b: (b, h, 0, 0)),  # c_kv cache
        pl.BlockSpec((1, 1, S, L), lambda h, b: (b, h, 0, 0)),  # k_r cache
    ]
    out_shapes = (
        jax.ShapeDtypeStruct((B, S, E), cdt),
        jax.ShapeDtypeStruct((B, H, S, L), cdt),
        jax.ShapeDtypeStruct((B, H, S, L), cdt),
    )

    itemsize = jnp.dtype(cdt).itemsize
    flops_per_step = 2 * S * D * L * 5 + 2 * S * S * (L + 2 * D) + 2 * S * D * D
    weight_bytes = sum(int(a.size) * jnp.dtype(a.dtype).itemsize
                       for a in (wdkv, gamma, beta, wkr, wqr, bqr, absorbed, wuv, wo))
    cost = pl.CostEstimate(
        flops=int(B * H * flops_per_step),
        transcendentals=int(B * H * S * S),
        bytes_accessed=int(2 * B * S * E * itemsize            # x in + out
                           + 2 * B * H * S * L * itemsize      # ckv + kr out
                           + weight_bytes
                           + (2 * S * D) * itemsize + S * S * 4),
    )

    out, ckv, kr = pl.pallas_call(
        kernel,
        grid=(H, B),   # batch innermost -> per-head weight blocks stay resident
        in_specs=in_specs,
        out_specs=out_specs,
        out_shape=out_shapes,
        compiler_params=pltpu.CompilerParams(
            dimension_semantics=("parallel", "arbitrary"),
            vmem_limit_bytes=64 * 1024 * 1024),
        cost_estimate=cost,
    )(x, wdkv, gamma, beta, wkr, wqr, bqr, absorbed, wuv, wo,
      sin_signed, cos, bias)

    # torch.cat(head_out, -1) is already realized by the column-blocked out spec.
    return out, ckv, kr


# ----------------------------------------------------------------------------
# Deterministic parameter init (mirrors nn.Linear / nn.LayerNorm shapes)
# ----------------------------------------------------------------------------
def init_params(key, n_heads, embd_dim, kv_latent_dim):
    H, E, L = n_heads, embd_dim, kv_latent_dim
    D = E // H
    keys = jax.random.split(key, 8)

    def w(k, shape, fan_in):
        bound = 1.0 / math.sqrt(fan_in)
        return jax.random.uniform(k, shape, jnp.float32, -bound, bound)

    # torch weight layout: (out_features, in_features), one per head
    w_q      = w(keys[0], (H, D, D), D)
    w_dkv    = w(keys[1], (H, L, D), D)
    w_uk     = w(keys[2], (H, L, D), D)
    w_uv     = w(keys[3], (H, L, D), D)
    w_o      = w(keys[4], (H, D, D), D)
    w_k_rope = w(keys[5], (H, L, D), D)
    w_q_rope = w(keys[6], (H, D, L), L)
    b_q_rope = w(keys[7], (H, D), L)

    gamma = jnp.ones((H, 1, L), jnp.float32)     # LayerNorm defaults
    beta  = jnp.zeros((H, 1, L), jnp.float32)

    # absorbed_k = w_q.weight @ w_uk.weight^T  -> (H, D, L)
    absorbed = jnp.einsum("hij,hkj->hik", w_q, w_uk)

    return {
        "wdkv": jnp.swapaxes(w_dkv, 1, 2),       # (H, D, L)
        "gamma": gamma, "beta": beta,
        "wkr": jnp.swapaxes(w_k_rope, 1, 2),     # (H, D, L)
        "wqr": jnp.swapaxes(w_q_rope, 1, 2),     # (H, L, D)
        "bqr": b_q_rope.reshape(H, 1, D),        # (H, 1, D)
        "absorbed": absorbed,                    # (H, D, L)
        "wuv": w_uv,                             # (H, L, D)  raw torch weight
        "wo": jnp.swapaxes(w_o, 1, 2),           # (H, D, D)
    }


# ----------------------------------------------------------------------------
# Pure-JAX reference (matches the PyTorch forward semantics)
# ----------------------------------------------------------------------------
def reference(x, params, n_heads, kv_latent_dim, past_length=0):
    B, S, E = x.shape
    H = n_heads; D = E // H; L = kv_latent_dim
    xh = x.reshape(B, S, H, D).transpose(0, 2, 1, 3)
    sin, cos = rope_sin_cos(S, D)                # D == L so one pair serves both
    outs, ckvs, krs = [], [], []
    for h in range(H):
        xi = xh[:, h]
        c = xi @ params["wdkv"][h]
        mu = c.mean(-1, keepdims=True)
        var = ((c - mu) ** 2).mean(-1, keepdims=True)
        nc = (c - mu) / jnp.sqrt(var + 1e-5) * params["gamma"][h] + params["beta"][h]
        k = xi @ params["wkr"][h]
        kr = k * cos + rotate_half(k) * sin
        q = nc @ params["wqr"][h] + params["bqr"][h]
        qr = q * cos + rotate_half(q) * sin
        s1 = jnp.einsum("bsl,btl->bst", xi @ params["absorbed"][h], nc)
        s2 = jnp.einsum("bsd,btd->bst", qr, kr)
        sc = (s1 + s2) / ((L + L) ** 0.5)
        mask = jnp.tril(jnp.ones((S, S)), k=past_length).astype(bool)
        sc = jnp.where(mask, sc, -jnp.inf)
        wgt = jax.nn.softmax(sc, axis=-1)
        v = nc @ params["wuv"][h]
        o = (wgt @ v) @ params["wo"][h]
        outs.append(o); ckvs.append(nc); krs.append(kr)
    return jnp.concatenate(outs, -1), jnp.stack(ckvs, 1), jnp.stack(krs, 1)


# ----------------------------------------------------------------------------
if __name__ == "__main__":
    B, S = 2, 8
    n_heads = 2
    head_dim = 128                    # lane-aligned (TPU lane width); == kv_latent_dim
    embd_dim = n_heads * head_dim     # 256
    kv_latent_dim = head_dim          # must equal head_dim for q_r @ k_r^T

    key = jax.random.PRNGKey(0)
    kx, kp = jax.random.split(key)
    x = jax.random.normal(kx, (B, S, embd_dim), dtype=jnp.float32)
    params = init_params(kp, n_heads, embd_dim, kv_latent_dim)

    ref_out, ref_ckv, ref_kr = reference(x, params, n_heads, kv_latent_dim)

    # --- f32 path ------------------------------------------------------------
    out, ckv, kr = mla_forward(x, params, n_heads, kv_latent_dim, past_length=0)
    out, ckv, kr = jax.block_until_ready((out, ckv, kr))
    assert out.shape == (B, S, embd_dim)
    assert ckv.shape == (B, n_heads, S, kv_latent_dim)
    assert kr.shape == (B, n_heads, S, kv_latent_dim)
    assert jnp.allclose(ckv, ref_ckv, rtol=1e-4, atol=1e-4)
    assert jnp.allclose(kr, ref_kr, rtol=1e-4, atol=1e-4)
    # output goes through the approx EUP reciprocal in softmax -> looser bound
    assert jnp.allclose(out, ref_out, rtol=1e-2, atol=1e-2)

    # --- bf16 operand path (v6e/v7x MXU fast path, f32 accumulation) ----------
    xb = x.astype(jnp.bfloat16)
    pb = {name: arr.astype(jnp.bfloat16) for name, arr in params.items()}
    out_b, ckv_b, kr_b = mla_forward(xb, pb, n_heads, kv_latent_dim, past_length=0)
    out_b, ckv_b, kr_b = jax.block_until_ready((out_b, ckv_b, kr_b))
    assert jnp.allclose(out_b.astype(jnp.float32), ref_out, rtol=1e-1, atol=1e-1)
    assert jnp.allclose(ckv_b.astype(jnp.float32), ref_ckv, rtol=1e-1, atol=1e-1)
    assert jnp.allclose(kr_b.astype(jnp.float32), ref_kr, rtol=1e-1, atol=1e-1)

    print("KERNEL_OK")
</pallas_src>

<mosaic_0001>
module attributes {stable_mosaic.version = 11 : i64} {
  func.func @_mla_head_kernel(%arg0: i32, %arg1: i32, %arg2: memref<1x8x128xf32, #tpu.memory_space<vmem>>, %arg3: memref<1x128x128xf32, #tpu.memory_space<vmem>>, %arg4: memref<1x1x128xf32, #tpu.memory_space<vmem>>, %arg5: memref<1x1x128xf32, #tpu.memory_space<vmem>>, %arg6: memref<1x128x128xf32, #tpu.memory_space<vmem>>, %arg7: memref<1x128x128xf32, #tpu.memory_space<vmem>>, %arg8: memref<1x1x128xf32, #tpu.memory_space<vmem>>, %arg9: memref<1x128x128xf32, #tpu.memory_space<vmem>>, %arg10: memref<1x128x128xf32, #tpu.memory_space<vmem>>, %arg11: memref<1x128x128xf32, #tpu.memory_space<vmem>>, %arg12: memref<8x128xf32, #tpu.memory_space<vmem>>, %arg13: memref<8x128xf32, #tpu.memory_space<vmem>>, %arg14: memref<8x8xf32, #tpu.memory_space<vmem>>, %arg15: memref<1x8x128xf32, #tpu.memory_space<vmem>>, %arg16: memref<1x1x8x128xf32, #tpu.memory_space<vmem>>, %arg17: memref<1x1x8x128xf32, #tpu.memory_space<vmem>>) attributes {dimension_semantics = [#tpu.dimension_semantics<parallel>, #tpu.dimension_semantics<arbitrary>], iteration_bounds = array<i64: 2, 2>, scalar_prefetch = 0 : i64, scratch_operands = 0 : i64, tpu.core_type = #tpu.core_type<tc>, window_params = [{transform_indices = @transform_0, window_bounds = array<i64: 1, 8, 128>}, {transform_indices = @transform_1, window_bounds = array<i64: 1, 128, 128>}, {transform_indices = @transform_2, window_bounds = array<i64: 1, 1, 128>}, {transform_indices = @transform_3, window_bounds = array<i64: 1, 1, 128>}, {transform_indices = @transform_4, window_bounds = array<i64: 1, 128, 128>}, {transform_indices = @transform_5, window_bounds = array<i64: 1, 128, 128>}, {transform_indices = @transform_6, window_bounds = array<i64: 1, 1, 128>}, {transform_indices = @transform_7, window_bounds = array<i64: 1, 128, 128>}, {transform_indices = @transform_8, window_bounds = array<i64: 1, 128, 128>}, {transform_indices = @transform_9, window_bounds = array<i64: 1, 128, 128>}, {pipeline_mode = #tpu.pipeline_mode<synchronous>, transform_indices = @transform_10, window_bounds = array<i64: 8, 128>}, {pipeline_mode = #tpu.pipeline_mode<synchronous>, transform_indices = @transform_11, window_bounds = array<i64: 8, 128>}, {pipeline_mode = #tpu.pipeline_mode<synchronous>, transform_indices = @transform_12, window_bounds = array<i64: 8, 8>}, {transform_indices = @transform_13, window_bounds = array<i64: 1, 8, 128>}, {transform_indices = @transform_14, window_bounds = array<i64: 1, 1, 8, 128>}, {transform_indices = @transform_15, window_bounds = array<i64: 1, 1, 8, 128>}]} {
    %c0 = arith.constant 0 : index
    %c0_0 = arith.constant 0 : index
    %c0_1 = arith.constant 0 : index
    %0 = vector.load %arg2[%c0, %c0_0, %c0_1] : memref<1x8x128xf32, #tpu.memory_space<vmem>>, vector<1x8x128xf32>
    %1 = vector.shape_cast %0 : vector<1x8x128xf32> to vector<8x128xf32>
    %c0_2 = arith.constant 0 : index
    %c0_3 = arith.constant 0 : index
    %2 = vector.load %arg13[%c0_2, %c0_3] : memref<8x128xf32, #tpu.memory_space<vmem>>, vector<8x128xf32>
    %c0_4 = arith.constant 0 : index
    %c0_5 = arith.constant 0 : index
    %3 = vector.load %arg12[%c0_4, %c0_5] : memref<8x128xf32, #tpu.memory_space<vmem>>, vector<8x128xf32>
    %c0_6 = arith.constant 0 : index
    %c0_7 = arith.constant 0 : index
    %c0_8 = arith.constant 0 : index
    %4 = vector.load %arg3[%c0_6, %c0_7, %c0_8] : memref<1x128x128xf32, #tpu.memory_space<vmem>>, vector<1x128x128xf32>
    %5 = vector.shape_cast %4 : vector<1x128x128xf32> to vector<128x128xf32>
    %cst = arith.constant dense<0.000000e+00> : vector<8x128xf32>
    %6 = tpu.matmul %1, %5, %cst {dimension_numbers = #tpu.dot_dimension_numbers<[1], [0], [0], [1], [0, 0, 1, 1], [], []>} : vector<8x128xf32>, vector<128x128xf32>, vector<8x128xf32> -> vector<8x128xf32>
    %cst_9 = arith.constant dense<0.000000e+00> : vector<8xf32>
    %7 = vector.multi_reduction <add>, %6, %cst_9 [1] : vector<8x128xf32> to vector<8xf32>
    %8 = vector.shape_cast %7 : vector<8xf32> to vector<8x1xf32>
    %cst_10 = arith.constant 1.280000e+02 : f32
    %9 = vector.broadcast %cst_10 : f32 to vector<8x1xf32>
    %10 = arith.divf %8, %9 : vector<8x1xf32>
    %11 = vector.broadcast %10 : vector<8x1xf32> to vector<8x128xf32>
    %12 = arith.subf %6, %11 : vector<8x128xf32>
    %13 = arith.mulf %12, %12 : vector<8x128xf32>
    %cst_11 = arith.constant dense<0.000000e+00> : vector<8xf32>
    %14 = vector.multi_reduction <add>, %13, %cst_11 [1] : vector<8x128xf32> to vector<8xf32>
    %15 = vector.shape_cast %14 : vector<8xf32> to vector<8x1xf32>
    %cst_12 = arith.constant 1.280000e+02 : f32
    %16 = vector.broadcast %cst_12 : f32 to vector<8x1xf32>
    %17 = arith.divf %15, %16 : vector<8x1xf32>
    %18 = vector.broadcast %10 : vector<8x1xf32> to vector<8x128xf32>
    %19 = arith.subf %6, %18 : vector<8x128xf32>
    %cst_13 = arith.constant 9.99999974E-6 : f32
    %20 = vector.broadcast %cst_13 : f32 to vector<8x1xf32>
    %21 = arith.addf %17, %20 : vector<8x1xf32>
    %22 = math.rsqrt %21 : vector<8x1xf32>
    %23 = vector.broadcast %22 : vector<8x1xf32> to vector<8x128xf32>
    %24 = arith.mulf %19, %23 : vector<8x128xf32>
    %c0_14 = arith.constant 0 : index
    %c0_15 = arith.constant 0 : index
    %c0_16 = arith.constant 0 : index
    %25 = vector.load %arg4[%c0_14, %c0_15, %c0_16] : memref<1x1x128xf32, #tpu.memory_space<vmem>>, vector<1x1x128xf32>
    %26 = vector.shape_cast %25 : vector<1x1x128xf32> to vector<1x128xf32>
    %27 = vector.broadcast %26 : vector<1x128xf32> to vector<8x128xf32>
    %28 = arith.mulf %24, %27 : vector<8x128xf32>
    %c0_17 = arith.constant 0 : index
    %c0_18 = arith.constant 0 : index
    %c0_19 = arith.constant 0 : index
    %29 = vector.load %arg5[%c0_17, %c0_18, %c0_19] : memref<1x1x128xf32, #tpu.memory_space<vmem>>, vector<1x1x128xf32>
    %30 = vector.shape_cast %29 : vector<1x1x128xf32> to vector<1x128xf32>
    %31 = vector.broadcast %30 : vector<1x128xf32> to vector<8x128xf32>
    %32 = arith.addf %28, %31 : vector<8x128xf32>
    %c0_20 = arith.constant 0 : index
    %c0_21 = arith.constant 0 : index
    %c0_22 = arith.constant 0 : index
    %33 = vector.load %arg6[%c0_20, %c0_21, %c0_22] : memref<1x128x128xf32, #tpu.memory_space<vmem>>, vector<1x128x128xf32>
    %34 = vector.shape_cast %33 : vector<1x128x128xf32> to vector<128x128xf32>
    %cst_23 = arith.constant dense<0.000000e+00> : vector<8x128xf32>
    %35 = tpu.matmul %1, %34, %cst_23 {dimension_numbers = #tpu.dot_dimension_numbers<[1], [0], [0], [1], [0, 0, 1, 1], [], []>} : vector<8x128xf32>, vector<128x128xf32>, vector<8x128xf32> -> vector<8x128xf32>
    %36 = arith.mulf %35, %2 : vector<8x128xf32>
    %c64_i32 = arith.constant 64 : i32
    %37 = tpu.dynamic_rotate %35 by %c64_i32 dim 1 : vector<8x128xf32>, i32 -> vector<8x128xf32>
    %38 = arith.mulf %37, %3 : vector<8x128xf32>
    %39 = arith.addf %36, %38 : vector<8x128xf32>
    %c0_24 = arith.constant 0 : index
    %c0_25 = arith.constant 0 : index
    %c0_26 = arith.constant 0 : index
    %40 = vector.load %arg7[%c0_24, %c0_25, %c0_26] : memref<1x128x128xf32, #tpu.memory_space<vmem>>, vector<1x128x128xf32>
    %41 = vector.shape_cast %40 : vector<1x128x128xf32> to vector<128x128xf32>
    %cst_27 = arith.constant dense<0.000000e+00> : vector<8x128xf32>
    %42 = tpu.matmul %32, %41, %cst_27 {dimension_numbers = #tpu.dot_dimension_numbers<[1], [0], [0], [1], [0, 0, 1, 1], [], []>} : vector<8x128xf32>, vector<128x128xf32>, vector<8x128xf32> -> vector<8x128xf32>
    %c0_28 = arith.constant 0 : index
    %c0_29 = arith.constant 0 : index
    %c0_30 = arith.constant 0 : index
    %43 = vector.load %arg8[%c0_28, %c0_29, %c0_30] : memref<1x1x128xf32, #tpu.memory_space<vmem>>, vector<1x1x128xf32>
    %44 = vector.shape_cast %43 : vector<1x1x128xf32> to vector<1x128xf32>
    %45 = vector.broadcast %44 : vector<1x128xf32> to vector<8x128xf32>
    %46 = arith.addf %42, %45 : vector<8x128xf32>
    %47 = arith.mulf %46, %2 : vector<8x128xf32>
    %c64_i32_31 = arith.constant 64 : i32
    %48 = tpu.dynamic_rotate %46 by %c64_i32_31 dim 1 : vector<8x128xf32>, i32 -> vector<8x128xf32>
    %49 = arith.mulf %48, %3 : vector<8x128xf32>
    %50 = arith.addf %47, %49 : vector<8x128xf32>
    %c0_32 = arith.constant 0 : index
    %c0_33 = arith.constant 0 : index
    %c0_34 = arith.constant 0 : index
    %51 = vector.load %arg9[%c0_32, %c0_33, %c0_34] : memref<1x128x128xf32, #tpu.memory_space<vmem>>, vector<1x128x128xf32>
    %52 = vector.shape_cast %51 : vector<1x128x128xf32> to vector<128x128xf32>
    %cst_35 = arith.constant dense<0.000000e+00> : vector<8x128xf32>
    %53 = tpu.matmul %1, %52, %cst_35 {dimension_numbers = #tpu.dot_dimension_numbers<[1], [0], [0], [1], [0, 0, 1, 1], [], []>} : vector<8x128xf32>, vector<128x128xf32>, vector<8x128xf32> -> vector<8x128xf32>
    %cst_36 = arith.constant dense<0.000000e+00> : vector<8x8xf32>
    %54 = tpu.matmul %53, %32, %cst_36 {dimension_numbers = #tpu.dot_dimension_numbers<[1], [1], [0], [0], [0, 0, 1, 0], [], []>} : vector<8x128xf32>, vector<8x128xf32>, vector<8x8xf32> -> vector<8x8xf32>
    %cst_37 = arith.constant dense<0.000000e+00> : vector<8x8xf32>
    %55 = tpu.matmul %50, %39, %cst_37 {dimension_numbers = #tpu.dot_dimension_numbers<[1], [1], [0], [0], [0, 0, 1, 0], [], []>} : vector<8x128xf32>, vector<8x128xf32>, vector<8x8xf32> -> vector<8x8xf32>
    %56 = arith.addf %54, %55 : vector<8x8xf32>
    %c0_38 = arith.constant 0 : index
    %c0_39 = arith.constant 0 : index
    %57 = vector.load %arg14[%c0_38, %c0_39] : memref<8x8xf32, #tpu.memory_space<vmem>>, vector<8x8xf32>
    %58 = arith.addf %56, %57 : vector<8x8xf32>
    %cst_40 = arith.constant dense<0xFF800000> : vector<8xf32>
    %59 = vector.multi_reduction <maximumf>, %58, %cst_40 [1] : vector<8x8xf32> to vector<8xf32>
    %60 = vector.shape_cast %59 : vector<8xf32> to vector<8x1xf32>
    %61 = vector.broadcast %60 : vector<8x1xf32> to vector<8x8xf32>
    %62 = arith.subf %58, %61 : vector<8x8xf32>
    %63 = math.exp %62 : vector<8x8xf32>
    %cst_41 = arith.constant dense<0.000000e+00> : vector<8xf32>
    %64 = vector.multi_reduction <add>, %63, %cst_41 [1] : vector<8x8xf32> to vector<8xf32>
    %65 = vector.shape_cast %64 : vector<8xf32> to vector<8x1xf32>
    %66 = tpu.reciprocal %65 {approx = true} : vector<8x1xf32> -> vector<8x1xf32>
    %67 = vector.broadcast %66 : vector<8x1xf32> to vector<8x8xf32>
    %68 = arith.mulf %63, %67 : vector<8x8xf32>
    %c0_42 = arith.constant 0 : index
    %c0_43 = arith.constant 0 : index
    %c0_44 = arith.constant 0 : index
    %69 = vector.load %arg10[%c0_42, %c0_43, %c0_44] : memref<1x128x128xf32, #tpu.memory_space<vmem>>, vector<1x128x128xf32>
    %70 = vector.shape_cast %69 : vector<1x128x128xf32> to vector<128x128xf32>
    %cst_45 = arith.constant dense<0.000000e+00> : vector<8x128xf32>
    %71 = tpu.matmul %32, %70, %cst_45 {dimension_numbers = #tpu.dot_dimension_numbers<[1], [0], [0], [1], [0, 0, 1, 1], [], []>} : vector<8x128xf32>, vector<128x128xf32>, vector<8x128xf32> -> vector<8x128xf32>
    %cst_46 = arith.constant dense<0.000000e+00> : vector<8x128xf32>
    %72 = tpu.matmul %68, %71, %cst_46 {dimension_numbers = #tpu.dot_dimension_numbers<[1], [0], [0], [1], [0, 0, 1, 1], [], []>} : vector<8x8xf32>, vector<8x128xf32>, vector<8x128xf32> -> vector<8x128xf32>
    %c0_47 = arith.constant 0 : index
    %c0_48 = arith.constant 0 : index
    %c0_49 = arith.constant 0 : index
    %73 = vector.load %arg11[%c0_47, %c0_48, %c0_49] : memref<1x128x128xf32, #tpu.memory_space<vmem>>, vector<1x128x128xf32>
    %74 = vector.shape_cast %73 : vector<1x128x128xf32> to vector<128x128xf32>
    %cst_50 = arith.constant dense<0.000000e+00> : vector<8x128xf32>
    %75 = tpu.matmul %72, %74, %cst_50 {dimension_numbers = #tpu.dot_dimension_numbers<[1], [0], [0], [1], [0, 0, 1, 1], [], []>} : vector<8x128xf32>, vector<128x128xf32>, vector<8x128xf32> -> vector<8x128xf32>
    %c0_51 = arith.constant 0 : index
    %c0_52 = arith.constant 0 : index
    %c0_53 = arith.constant 0 : index
    %76 = vector.load %arg15[%c0_51, %c0_52, %c0_53] : memref<1x8x128xf32, #tpu.memory_space<vmem>>, vector<1x8x128xf32>
    %77 = vector.shape_cast %76 : vector<1x8x128xf32> to vector<8x128xf32>
    %78 = vector.shape_cast %75 : vector<8x128xf32> to vector<1x8x128xf32>
    tpu.vector_store %arg15[%c0_51, %c0_52, %c0_53], %78 {strides = array<i32>} : memref<1x8x128xf32, #tpu.memory_space<vmem>>, vector<1x8x128xf32>,
    %c0_54 = arith.constant 0 : index
    %c0_55 = arith.constant 0 : index
    %c0_56 = arith.constant 0 : index
    %c0_57 = arith.constant 0 : index
    %79 = vector.load %arg16[%c0_54, %c0_55, %c0_56, %c0_57] : memref<1x1x8x128xf32, #tpu.memory_space<vmem>>, vector<1x1x8x128xf32>
    %80 = vector.shape_cast %79 : vector<1x1x8x128xf32> to vector<8x128xf32>
    %81 = vector.shape_cast %32 : vector<8x128xf32> to vector<1x1x8x128xf32>
    tpu.vector_store %arg16[%c0_54, %c0_55, %c0_56, %c0_57], %81 {strides = array<i32>} : memref<1x1x8x128xf32, #tpu.memory_space<vmem>>, vector<1x1x8x128xf32>,
    %c0_58 = arith.constant 0 : index
    %c0_59 = arith.constant 0 : index
    %c0_60 = arith.constant 0 : index
    %c0_61 = arith.constant 0 : index
    %82 = vector.load %arg17[%c0_58, %c0_59, %c0_60, %c0_61] : memref<1x1x8x128xf32, #tpu.memory_space<vmem>>, vector<1x1x8x128xf32>
    %83 = vector.shape_cast %82 : vector<1x1x8x128xf32> to vector<8x128xf32>
    %84 = vector.shape_cast %39 : vector<8x128xf32> to vector<1x1x8x128xf32>
    tpu.vector_store %arg17[%c0_58, %c0_59, %c0_60, %c0_61], %84 {strides = array<i32>} : memref<1x1x8x128xf32, #tpu.memory_space<vmem>>, vector<1x1x8x128xf32>,
    return
  }
  func.func @transform_0(%arg0: i32, %arg1: i32) -> (i32, i32, i32) {
    %c0_i32 = arith.constant 0 : i32
    %c0_i32_0 = arith.constant 0 : i32
    return %arg1, %c0_i32, %arg0 : i32, i32, i32
  }
  func.func @transform_1(%arg0: i32, %arg1: i32) -> (i32, i32, i32) {
    %c0_i32 = arith.constant 0 : i32
    %c0_i32_0 = arith.constant 0 : i32
    %c0_i32_1 = arith.constant 0 : i32
    return %arg0, %c0_i32, %c0_i32_0 : i32, i32, i32
  }
  func.func @transform_2(%arg0: i32, %arg1: i32) -> (i32, i32, i32) {
    %c0_i32 = arith.constant 0 : i32
    %c0_i32_0 = arith.constant 0 : i32
    %c0_i32_1 = arith.constant 0 : i32
    return %arg0, %c0_i32, %c0_i32_0 : i32, i32, i32
  }
  func.func @transform_3(%arg0: i32, %arg1: i32) -> (i32, i32, i32) {
    %c0_i32 = arith.constant 0 : i32
    %c0_i32_0 = arith.constant 0 : i32
    %c0_i32_1 = arith.constant 0 : i32
    return %arg0, %c0_i32, %c0_i32_0 : i32, i32, i32
  }
  func.func @transform_4(%arg0: i32, %arg1: i32) -> (i32, i32, i32) {
    %c0_i32 = arith.constant 0 : i32
    %c0_i32_0 = arith.constant 0 : i32
    %c0_i32_1 = arith.constant 0 : i32
    return %arg0, %c0_i32, %c0_i32_0 : i32, i32, i32
  }
  func.func @transform_5(%arg0: i32, %arg1: i32) -> (i32, i32, i32) {
    %c0_i32 = arith.constant 0 : i32
    %c0_i32_0 = arith.constant 0 : i32
    %c0_i32_1 = arith.constant 0 : i32
    return %arg0, %c0_i32, %c0_i32_0 : i32, i32, i32
  }
  func.func @transform_6(%arg0: i32, %arg1: i32) -> (i32, i32, i32) {
    %c0_i32 = arith.constant 0 : i32
    %c0_i32_0 = arith.constant 0 : i32
    %c0_i32_1 = arith.constant 0 : i32
    return %arg0, %c0_i32, %c0_i32_0 : i32, i32, i32
  }
  func.func @transform_7(%arg0: i32, %arg1: i32) -> (i32, i32, i32) {
    %c0_i32 = arith.constant 0 : i32
    %c0_i32_0 = arith.constant 0 : i32
    %c0_i32_1 = arith.constant 0 : i32
    return %arg0, %c0_i32, %c0_i32_0 : i32, i32, i32
  }
  func.func @transform_8(%arg0: i32, %arg1: i32) -> (i32, i32, i32) {
    %c0_i32 = arith.constant 0 : i32
    %c0_i32_0 = arith.constant 0 : i32
    %c0_i32_1 = arith.constant 0 : i32
    return %arg0, %c0_i32, %c0_i32_0 : i32, i32, i32
  }
  func.func @transform_9(%arg0: i32, %arg1: i32) -> (i32, i32, i32) {
    %c0_i32 = arith.constant 0 : i32
    %c0_i32_0 = arith.constant 0 : i32
    %c0_i32_1 = arith.constant 0 : i32
    return %arg0, %c0_i32, %c0_i32_0 : i32, i32, i32
  }
  func.func @transform_10(%arg0: i32, %arg1: i32) -> (i32, i32) {
    %c0_i32 = arith.constant 0 : i32
    %c0_i32_0 = arith.constant 0 : i32
    %c0_i32_1 = arith.constant 0 : i32
    return %c0_i32, %c0_i32_0 : i32, i32
  }
  func.func @transform_11(%arg0: i32, %arg1: i32) -> (i32, i32) {
    %c0_i32 = arith.constant 0 : i32
    %c0_i32_0 = arith.constant 0 : i32
    %c0_i32_1 = arith.constant 0 : i32
    return %c0_i32, %c0_i32_0 : i32, i32
  }
  func.func @transform_12(%arg0: i32, %arg1: i32) -> (i32, i32) {
    %c0_i32 = arith.constant 0 : i32
    %c0_i32_0 = arith.constant 0 : i32
    %c0_i32_1 = arith.constant 0 : i32
    return %c0_i32, %c0_i32_0 : i32, i32
  }
  func.func @transform_13(%arg0: i32, %arg1: i32) -> (i32, i32, i32) {
    %c0_i32 = arith.constant 0 : i32
    %c0_i32_0 = arith.constant 0 : i32
    return %arg1, %c0_i32, %arg0 : i32, i32, i32
  }
  func.func @transform_14(%arg0: i32, %arg1: i32) -> (i32, i32, i32, i32) {
    %c0_i32 = arith.constant 0 : i32
    %c0_i32_0 = arith.constant 0 : i32
    %c0_i32_1 = arith.constant 0 : i32
    return %arg1, %arg0, %c0_i32, %c0_i32_0 : i32, i32, i32, i32
  }
  func.func @transform_15(%arg0: i32, %arg1: i32) -> (i32, i32, i32, i32) {
    %c0_i32 = arith.constant 0 : i32
    %c0_i32_0 = arith.constant 0 : i32
    %c0_i32_1 = arith.constant 0 : i32
    return %arg1, %arg0, %c0_i32, %c0_i32_0 : i32, i32, i32, i32
  }
}

</mosaic_0001>

<bundles_post_ra>
// kernel: tpu_custom_call.1
= control target key start
LH: loop header
LB: loop body
LE: loop exit
PB: predicated region body
PF: predicated region fallthrough
CT: control target
= control target key end

     0   :  { %s4536_s0 = inlined_call_operand.hbm [shape: f32[2,8,256], index: 0, kind: input, shape index: {}]   ;;  %s4537_s1 = inlined_call_operand.hbm [shape: f32[2,128,128], index: 1, kind: input, shape index: {}]   ;;  %s4538_s2 = inlined_call_operand.hbm [shape: f32[2,1,128], index: 2, kind: input, shape index: {}]   ;;  %s4539_s3 = inlined_call_operand.hbm [shape: f32[2,1,128], index: 3, kind: input, shape index: {}]   ;;  %s4540_s4 = inlined_call_operand.hbm [shape: f32[2,128,128], index: 4, kind: input, shape index: {}]   ;;  %s4541_s5 = inlined_call_operand.hbm [shape: f32[2,128,128], index: 5, kind: input, shape index: {}]   ;;  %s4542_s6 = inlined_call_operand.hbm [shape: f32[2,1,128], index: 6, kind: input, shape index: {}]   ;;  %s4543_s7 = inlined_call_operand.hbm [shape: f32[2,128,128], index: 7, kind: input, shape index: {}]   ;;  %s4544_s8 = inlined_call_operand.hbm [shape: f32[2,128,128], index: 8, kind: input, shape index: {}]   ;;  %s4545_s9 = inlined_call_operand.hbm [shape: f32[2,128,128], index: 9, kind: input, shape index: {}]   ;;  %s4546_s10 = inlined_call_operand.hbm [shape: f32[8,128], index: 10, kind: input, shape index: {}]   ;;  %s4547_s11 = inlined_call_operand.hbm [shape: f32[8,128], index: 11, kind: input, shape index: {}]   ;;  %s4548_s12 = inlined_call_operand.hbm [shape: f32[8,8], index: 12, kind: input, shape index: {}]   ;;  %s4549_s13 = inlined_call_operand.hbm [shape: f32[2,8,256], index: 13, kind: output, shape index: {0}]   ;;  %s4550_s14 = inlined_call_operand.hbm [shape: f32[2,2,8,128], index: 14, kind: output, shape index: {1}]   ;;  %s4551_s15 = inlined_call_operand.hbm [shape: f32[2,2,8,128], index: 15, kind: output, shape index: {2}]  }
   0x1   :  { %4603 = sst [smem:[#allocation51_spill]] %s4536_s0 }
   0x2   :  { %4604 = sst [smem:[#allocation52_spill]] %s4537_s1 }
   0x3   :  { %4605 = sst [smem:[#allocation53_spill]] %s4538_s2 }
   0x4   :  { %4606 = sst [smem:[#allocation54_spill]] %s4539_s3 }
   0x5   :  { %4607 = sst [smem:[#allocation55_spill]] %s4540_s4 }
   0x6   :  { %4608 = sst [smem:[#allocation56_spill]] %s4541_s5 }
   0x7   :  { %4609 = sst [smem:[#allocation57_spill]] %s4542_s6 }
   0x8   :  { %4610 = sst [smem:[#allocation58_spill]] %s4543_s7 }
   0x9   :  { %4611 = sst [smem:[#allocation59_spill]] %s4544_s8 }
   0xa   :  { %4612 = sst [smem:[#allocation60_spill]] %s4545_s9 }
   0xb   :  { %4613 = sst [smem:[#allocation61_spill]] %s4546_s10 }
   0xc   :  { %4614 = sst [smem:[#allocation62_spill]] %s4547_s11 }
   0xd   :  { %4615 = sst [smem:[#allocation63_spill]] %s4548_s12 }
   0xe   :  { %4616 = sst [smem:[#allocation64_spill]] %s4549_s13 }
   0xf   :  { %4617 = sst [smem:[#allocation65_spill]] %s4550_s14 }
  0x10   :  { %4618 = sst [smem:[#allocation66_spill]] %s4551_s15 }
  0x11   :  { %21 = vsyncpa [#allocation3], 0 }
  0x12   :  { %23 = vsyncpa [#allocation3 + $0x1], 0 }
  0x13   :  { %24 = vsyncpa [#allocation6], 0 }
  0x14   :  { %26 = vsyncpa [#allocation6 + $0x1], 0 }
  0x15   :  { %27 = vsyncpa [#allocation9], 0 }
  0x16   :  { %29 = vsyncpa [#allocation9 + $0x1], 0 }
  0x17   :  { %30 = vsyncpa [#allocation12], 0 }
  0x18   :  { %32 = vsyncpa [#allocation12 + $0x1], 0 }
  0x19   :  { %33 = vsyncpa [#allocation15], 0 }
  0x1a   :  { %35 = vsyncpa [#allocation15 + $0x1], 0 }
  0x1b   :  { %36 = vsyncpa [#allocation18], 0 }
  0x1c   :  { %38 = vsyncpa [#allocation18 + $0x1], 0 }
  0x1d   :  { %39 = vsyncpa [#allocation21], 0 }
  0x1e   :  { %40 = vsyncpa [#allocation4], 0 }
  0x1f   :  { %42 = vsyncpa [#allocation4 + $0x1], 0 }
  0x20   :  { %43 = vsyncpa [#allocation25], 0 }
  0x21   :  { %45 = vsyncpa [#allocation25 + $0x1], 0  ;;  %s3572_s18 = smov 0   ;;  %s3574_s19 = smov 0  }
  0x22   :  { %s3576_s20 = smov 0   ;;  %s3578_s21 = smov 0  }
  0x23   :  { %s3580_s22 = smov 0   ;;  %s3582_s23 = smov 0  }
  0x24   :  { %s3584_s24 = smov 0   ;;  %s3586_s25 = smov 0  }
  0x25   :  { %s3588_s26 = smov 0   ;;  %s3590_s27 = smov 0  }
  0x26   :  { %s3592_s28 = smov 0  }
  0x27 LB: > { %4619 = sst [smem:[#allocation37_spill]] %s3432_s19  ;;  %s3626_s29 = sadd.s32 4294967295, %s3468_s28   ;;  %s3468_s28 = sphi %s3592_s28, %s51_s28   ;;  %s3464_s27 = sphi %s3590_s27, %s4705_s27   ;;  %s3460_s26 = sphi %s3588_s26, %s4704_s26   ;;  %s3456_s25 = sphi %s3586_s25, %s4703_s25   ;;  %s3452_s24 = sphi %s3584_s24, %s4702_s24   ;;  %s3448_s23 = sphi %s3582_s23, %s4709_s23   ;;  %s3444_s22 = sphi %s3580_s22, %s4708_s22   ;;  %s3440_s21 = sphi %s3578_s21, %s4707_s21   ;;  %s3436_s20 = sphi %s3576_s20, %s4706_s20   ;;  %s3432_s19 = sphi %s3574_s19, %s4701_s19   ;;  %s3428_s18 = sphi %s3572_s18, %s4700_s18  }
  0x28   : > { %4620 = sst [smem:[#allocation38_spill]] %s3436_s20  ;;  %p4563_p0 = scmp.eq.s32.totalorder %s3468_s28, 0 }
  0x29   : > { %4621 = sst [smem:[#allocation39_spill]] %s3440_s21  ;;  %p4562_p1 = scmp.eq.s32.totalorder %s3626_s29, 0 }
  0x2a   : > { %4622 = sst [smem:[#allocation40_spill]] %s3452_s24  ;;  %p105_p2 = scmp.ne.s32.totalorder %s3436_s20, %s3432_s19 }
  0x2b   : > { %4623 = sst [smem:[#allocation41_spill]] %s3456_s25  ;;  %p111_p3 = scmp.ne.s32.totalorder %s3432_s19, %s3428_s18 }
  0x2c   : > { %4624 = sst [smem:[#allocation42_spill]] %s3460_s26  ;;  %p2133_p4 = scmp.ge.s32.totalorder %s3468_s28, 1 }
  0x2d   : > { %4625 = sst [smem:[#allocation43_spill]] %s3464_s27  ;;  %p107_p5 = por %p105_p2, %p4563_p0 }
  0x2e   : > { %4626 = sst [smem:[#allocation44_spill]] %s3626_s29  ;;  %p477_p6 = scmp.lt.s32.totalorder %s3468_s28, 5 }
  0x2f   : > { %p3639_p7 = por %p111_p3, %p4562_p1  ;;  %s3470_s17 = smov [#allocation19]  }
  0x30   : > { %p3643_p8 = pnand %p2133_p4, %p477_p6  ;;  %s490_s13 = sshll.u32 %s3470_s17, 4  ;;  %s491_s13 = int_to_ptr.vmem [resolvable:$true] %s490_s13 }
  0x31   : > { %s4627_s30 = scalar_select %p3639_p7, 1, 0 }
  0x32   : > { %s4629_s16 = scalar_select %p3643_p8, 1, 0 }
  0x33   : > { %4628 = sst [smem:[#allocation45_spill]] %s4627_s30  ;;  %p2712_p9 = pneg %p3643_p8 }
  0x34   : > { %4630 = sst [smem:[#allocation46_spill]] %s4629_s16  ;;  %p4561_p10 = scmp.lt.s32.totalorder %s3468_s28, 4 }
  0x35   : > { %p3652_p11 = pnand %p2712_p9, %p4562_p1  ;;  %s3471_s15 = smov [#allocation20]  }
  0x36   : > { %s501_s14 = sshll.u32 %s3471_s15, 4  ;;  %p3658_p12 = pnand %p4561_p10, %p107_p5  ;;  %s3662_s14 = int_to_ptr.vmem [resolvable:$true] %s501_s14 }
  0x37   : > { %s4631_s18 = scalar_select %p3652_p11, 1, 0 }
  0x38   : > { %s4632_s25 = scalar_select %p3658_p12, 1, 0 }
  0x39   : > { %s4633_s10 = sld [smem:[#allocation61_spill]]  ;;  %p3672_p2 = pneg %p3652_p11 }
  0x3b   : > { %s4634_s9 = scalar_select %p3672_p2, 1, 0 }
  0x3f   : > { %s2874_s30 = scalar_lea.hbm %s4633_s10, 128 }
  0x40   : > { %p2875_p13 = scmp.ne.s32.totalorder %s4633_s10, %s2874_s30  ;;  %p2881_p5 = scmp.lt.u32.totalorder %s2874_s30, %s4633_s10 }
  0x42   : > { %p2877_p3 = pnand %p3672_p2, %p2875_p13 }
  0x44   : > { %p2878_p4 = pneg %p2877_p3 }
  0x46   : > { %p2883_p6 = pnand %p2881_p5, %p2878_p4 }
  0x48   : > { %2886 = shalt.err (!%p2883_p6)
}
  0x49   : > { %s2887_s24 = scalar_lea.vmem %s491_s13, 128  ;;  %p2895_p0 = scmp.lt.s32.totalorder %s491_s13, %s491_s13 }
  0x4a   : > { %p2888_p9 = scmp.ne.s32.totalorder %s491_s13, %s2887_s24  ;;  %p2896_p7 = scmp.lt.s32.totalorder %s2887_s24, %s2887_s24 }
  0x4c   : > { %p2890_p10 = pnand %p2888_p9, %p3672_p2  ;;  %p2897_p8 = por %p2896_p7, %p2895_p0 }
  0x4e   : > { %p2891_p1 = pneg %p2890_p10 }
  0x50   : > { %p2898_p12 = pnand %p2897_p8, %p2891_p1 }
  0x52   : > { %2901 = shalt.err (!%p2898_p12)
}
  0x53   : > { %2715 = dma.hbm_to_vmem [thread:$0]  (!%p3652_p11), %s4633_s10, 128, %s491_s13, [#allocation18]  }
  0x54   : > { %s4635_s11 = sld [smem:[#allocation62_spill]] }
  0x5a   : > { %s2902_s17 = scalar_lea.hbm %s4635_s11, 128 }
  0x5b   : > { %p2903_p10 = scmp.ne.s32.totalorder %s4635_s11, %s2902_s17  ;;  %p2909_p1 = scmp.lt.u32.totalorder %s2902_s17, %s4635_s11 }
  0x5d   : > { %p2905_p13 = pnand %p2903_p10, %p3672_p2 }
  0x5f   : > { %p2906_p0 = pneg %p2905_p13 }
  0x61   : > { %p2911_p7 = pnand %p2909_p1, %p2906_p0 }
  0x63   : > { %2914 = shalt.err (!%p2911_p7)
}
  0x64   : > { %s2915_s13 = scalar_lea.vmem %s3662_s14, 128  ;;  %p2923_p4 = scmp.lt.s32.totalorder %s3662_s14, %s3662_s14 }
  0x65   : > { %p2916_p8 = scmp.ne.s32.totalorder %s3662_s14, %s2915_s13  ;;  %p2924_p5 = scmp.lt.s32.totalorder %s2915_s13, %s2915_s13 }
  0x67   : > { %p2918_p12 = pnand %p2916_p8, %p3672_p2  ;;  %p2925_p6 = por %p2924_p5, %p2923_p4 }
  0x69   : > { %p2919_p3 = pneg %p2918_p12 }
  0x6b   : > { %p2926_p9 = pnand %p2925_p6, %p2919_p3 }
  0x6d   : > { %2929 = shalt.err (!%p2926_p9)
}
  0x6e   : > { %2718 = dma.hbm_to_vmem [thread:$0]  (!%p3652_p11), %s4635_s11, 128, %s3662_s14, [#allocation21]  }
  0x6f   : > { %s3712_s19 = sand.u32 1, %s3468_s28   ;;  %s3715_s16 = sand.u32 1, %s3436_s20  }
  0x70   : > { %s3718_s8 = sshll.u32 %s3715_s16, 7  ;;  %s3721_s30 = sshll.u32 %s3464_s27, 11 }
  0x71   : > { %s4636_s1 = sld [smem:[#allocation52_spill]]  ;;  %s547_s14 = scalar_lea.vmem [#allocation5], %s3718_s8 }
  0x72   : > { %s554_s13 = sshll.u32 %s547_s14, 4  ;;  %s3733_s4 = sshll.u32 %s3464_s27, 4  ;;  %s3730_s13 = int_to_ptr.vmem [resolvable:$true] %s554_s13 }
  0x73   : > { %p4637_p13 = scmp.ne.s32.totalorder %s4632_s25, 0 }
  0x75   : > { %p3740_p0 = pneg %p4637_p13 }
  0x77   : > { %s3727_s24 = scalar_lea.hbm %s4636_s1, %s3721_s30  ;;  %s2935_s14 = scalar_lea.hbm %s4636_s1, 4096 }
  0x78   : > { %s2930_s10 = scalar_lea.hbm %s3727_s24, 2048  ;;  %p2936_p8 = scmp.lt.u32.totalorder %s3727_s24, %s4636_s1 }
  0x79   : > { %p2931_p10 = scmp.ne.s32.totalorder %s3727_s24, %s2930_s10  ;;  %p2937_p12 = scmp.lt.u32.totalorder %s2935_s14, %s2930_s10 }
  0x7a   : > { %p2939_p4 = scmp.lt.u32.totalorder %s2930_s10, %s3727_s24 }
  0x7b   : > { %p2933_p1 = pnand %p3740_p0, %p2931_p10  ;;  %p2938_p3 = por %p2937_p12, %p2936_p8 }
  0x7d   : > { %p2934_p7 = pneg %p2933_p1  ;;  %p2940_p5 = por %p2939_p4, %p2938_p3 }
  0x7f   : > { %p2941_p6 = pnand %p2940_p5, %p2934_p7 }
  0x81   : > { %2944 = shalt.err (!%p2941_p6)
}
  0x82   : > { %s2945_s6 = scalar_lea.vmem %s3730_s13, 2048  ;;  %s3472_s17 = smov [#allocation5]  }
  0x83   : > { %p2946_p9 = scmp.ne.s32.totalorder %s3730_s13, %s2945_s6  ;;  %s2950_s15 = sshll.u32 %s3472_s17, 4  ;;  %s2951_s15 = int_to_ptr.vmem [resolvable:$false] %s2950_s15 }
  0x84   : > { %s2952_s0 = scalar_lea.vmem %s2951_s15, 4096  ;;  %p2953_p11 = scmp.lt.s32.totalorder %s3730_s13, %s2951_s15 }
  0x85   : > { %p2948_p10 = pnand %p2946_p9, %p3740_p0  ;;  %p2954_p2 = scmp.lt.s32.totalorder %s2952_s0, %s2945_s6 }
  0x87   : > { %p2949_p1 = pneg %p2948_p10  ;;  %p2955_p8 = por %p2954_p2, %p2953_p11 }
  0x89   : > { %p2956_p12 = pnand %p2955_p8, %p2949_p1 }
  0x8b   : > { %2959 = shalt.err (!%p2956_p12)
}
  0x8c   : > { %s4579_s2 = smov 128   ;;  %s4586_s10 = smov 8  }
  0x8d   : > { %s4639_s14 = scalar_lea.sflag [#allocation6], %s3712_s19  ;;  %s4640_s3 = sld [smem:[#allocation54_spill]] }
  0x8e   : > { %2728 = dma.hbm_to_vmem [thread:$0]  (!%p4637_p13), %s3727_s24, 2048, %s3730_s13, %s4639_s14, %s4579_s2, %s4579_s2, %s4586_s10  }
  0x8f   : > { %s584_s0 = scalar_lea.vmem [#allocation8], %s3715_s16  ;;  %s4583_s29 = scalar_lea.sflag [#allocation9], %s3712_s19 }
  0x90   : > { %s591_s1 = sshll.u32 %s584_s0, 4  ;;  %s592_s1 = int_to_ptr.vmem [resolvable:$true] %s591_s1 }
  0x93   : > { %s3772_s15 = scalar_lea.hbm %s4640_s3, %s3733_s4  ;;  %s2965_s13 = scalar_lea.hbm %s4640_s3, 32 }
  0x94   : > { %s2960_s20 = scalar_lea.hbm %s3772_s15, 16  ;;  %p2966_p3 = scmp.lt.u32.totalorder %s3772_s15, %s4640_s3 }
  0x95   : > { %p2961_p11 = scmp.ne.s32.totalorder %s3772_s15, %s2960_s20  ;;  %p2967_p4 = scmp.lt.u32.totalorder %s2965_s13, %s2960_s20 }
  0x96   : > { %p2969_p6 = scmp.lt.u32.totalorder %s2960_s20, %s3772_s15 }
  0x97   : > { %p2963_p2 = pnand %p2961_p11, %p3740_p0  ;;  %p2968_p5 = por %p2967_p4, %p2966_p3 }
  0x99   : > { %p2964_p7 = pneg %p2963_p2  ;;  %p2970_p9 = por %p2969_p6, %p2968_p5 }
  0x9b   : > { %p2971_p10 = pnand %p2970_p9, %p2964_p7 }
  0x9d   : > { %2974 = shalt.err (!%p2971_p10)
}
  0x9e   : > { %s2975_s17 = scalar_lea.vmem %s592_s1, 16  ;;  %s3475_s0 = smov [#allocation8]  }
  0x9f   : > { %p2976_p1 = scmp.ne.s32.totalorder %s592_s1, %s2975_s17  ;;  %s2980_s2 = sshll.u32 %s3475_s0, 4  ;;  %s2981_s2 = int_to_ptr.vmem [resolvable:$false] %s2980_s2 }
  0xa0   : > { %s2982_s21 = scalar_lea.vmem %s2981_s2, 32  ;;  %p2983_p11 = scmp.lt.s32.totalorder %s592_s1, %s2981_s2 }
  0xa1   : > { %p2978_p8 = pnand %p2976_p1, %p3740_p0  ;;  %p2984_p2 = scmp.lt.s32.totalorder %s2982_s21, %s2975_s17 }
  0xa3   : > { %p2979_p12 = pneg %p2978_p8  ;;  %p2985_p13 = por %p2984_p2, %p2983_p11 }
  0xa5   : > { %p2986_p3 = pnand %p2985_p13, %p2979_p12 }
  0xa7   : > { %2989 = shalt.err (!%p2986_p3)
}
  0xa8   : > { %p4641_p4 = scmp.ne.s32.totalorder %s4632_s25, 0  ;;  %s4642_s5 = sld [smem:[#allocation56_spill]] }
  0xa9   : > { %s623_s2 = scalar_lea.vmem [#allocation11], %s3718_s8  ;;  %s4582_s6 = scalar_lea.sflag [#allocation12], %s3712_s19 }
  0xaa   : > { %2734 = dma.hbm_to_vmem [thread:$0]  (!%p4641_p4), %s3772_s15, 16, %s592_s1, %s4583_s29  }
  0xab   : > { %s630_s14 = sshll.u32 %s623_s2, 4  ;;  %s3802_s14 = int_to_ptr.vmem [resolvable:$true] %s630_s14 }
  0xae   : > { %s3799_s13 = scalar_lea.hbm %s4642_s5, %s3721_s30  ;;  %s2995_s0 = scalar_lea.hbm %s4642_s5, 4096 }
  0xaf   : > { %s2990_s17 = scalar_lea.hbm %s3799_s13, 2048  ;;  %p2996_p6 = scmp.lt.u32.totalorder %s3799_s13, %s4642_s5 }
  0xb0   : > { %p2991_p13 = scmp.ne.s32.totalorder %s3799_s13, %s2990_s17  ;;  %p2997_p9 = scmp.lt.u32.totalorder %s2995_s0, %s2990_s17 }
  0xb1   : > { %p2999_p1 = scmp.lt.u32.totalorder %s2990_s17, %s3799_s13 }
  0xb2   : > { %p2993_p7 = pnand %p2991_p13, %p3740_p0  ;;  %p2998_p10 = por %p2997_p9, %p2996_p6 }
  0xb4   : > { %p2994_p5 = pneg %p2993_p7  ;;  %p3000_p8 = por %p2999_p1, %p2998_p10 }
  0xb6   : > { %p3001_p12 = pnand %p3000_p8, %p2994_p5 }
  0xb8   : > { %3004 = shalt.err (!%p3001_p12)
}
  0xb9   : > { %s3005_s24 = scalar_lea.vmem %s3802_s14, 2048  ;;  %s3476_s2 = smov [#allocation11]  }
  0xba   : > { %p3006_p11 = scmp.ne.s32.totalorder %s3802_s14, %s3005_s24  ;;  %s3010_s1 = sshll.u32 %s3476_s2, 4  ;;  %s3011_s1 = int_to_ptr.vmem [resolvable:$false] %s3010_s1 }
  0xbb   : > { %s3012_s15 = scalar_lea.vmem %s3011_s1, 4096  ;;  %p3013_p13 = scmp.lt.s32.totalorder %s3802_s14, %s3011_s1 }
  0xbc   : > { %p3008_p2 = pnand %p3006_p11, %p3740_p0  ;;  %p3014_p7 = scmp.lt.s32.totalorder %s3012_s15, %s3005_s24 }
  0xbe   : > { %p3009_p3 = pneg %p3008_p2  ;;  %p3015_p6 = por %p3014_p7, %p3013_p13 }
  0xc0   : > { %p3016_p9 = pnand %p3015_p6, %p3009_p3 }
  0xc2   : > { %3019 = shalt.err (!%p3016_p9)
}
  0xc3   : > { %s4643_s17 = smov 128   ;;  %s4644_s7 = sld [smem:[#allocation58_spill]] }
  0xc4   : > { %2740 = dma.hbm_to_vmem [thread:$0]  (!%p4641_p4), %s3799_s13, 2048, %s3802_s14, %s4582_s6, %s4643_s17, %s4643_s17, %s4586_s10  }
  0xc5   : > { %s661_s24 = scalar_lea.vmem [#allocation14], %s3718_s8  ;;  %s4585_s1 = scalar_lea.sflag [#allocation15], %s3712_s19 }
  0xc6   : > { %s668_s2 = sshll.u32 %s661_s24, 4  ;;  %s3838_s2 = int_to_ptr.vmem [resolvable:$true] %s668_s2 }
  0xc9   : > { %s3835_s20 = scalar_lea.hbm %s4644_s7, %s3721_s30  ;;  %s3025_s0 = scalar_lea.hbm %s4644_s7, 4096 }
  0xca   : > { %s3020_s15 = scalar_lea.hbm %s3835_s20, 2048  ;;  %p3026_p8 = scmp.lt.u32.totalorder %s3835_s20, %s4644_s7 }
  0xcb   : > { %p3021_p5 = scmp.ne.s32.totalorder %s3835_s20, %s3020_s15  ;;  %p3027_p12 = scmp.lt.u32.totalorder %s3025_s0, %s3020_s15 }
  0xcc   : > { %p3029_p2 = scmp.lt.u32.totalorder %s3020_s15, %s3835_s20 }
  0xcd   : > { %p3023_p10 = pnand %p3021_p5, %p3740_p0  ;;  %p3028_p11 = por %p3027_p12, %p3026_p8 }
  0xcf   : > { %p3024_p1 = pneg %p3023_p10  ;;  %p3030_p3 = por %p3029_p2, %p3028_p11 }
  0xd1   : > { %p3031_p13 = pnand %p3030_p3, %p3024_p1 }
  0xd3   : > { %3034 = shalt.err (!%p3031_p13)
}
  0xd4   : > { %s3035_s24 = scalar_lea.vmem %s3838_s2, 2048  ;;  %s3477_s13 = smov [#allocation14]  }
  0xd5   : > { %p3036_p7 = scmp.ne.s32.totalorder %s3838_s2, %s3035_s24  ;;  %s3040_s14 = sshll.u32 %s3477_s13, 4  ;;  %s3041_s14 = int_to_ptr.vmem [resolvable:$false] %s3040_s14 }
  0xd6   : > { %s3042_s6 = scalar_lea.vmem %s3041_s14, 4096  ;;  %p3043_p5 = scmp.lt.s32.totalorder %s3838_s2, %s3041_s14 }
  0xd7   : > { %p3038_p6 = pnand %p3036_p7, %p3740_p0  ;;  %p3044_p10 = scmp.lt.s32.totalorder %s3042_s6, %s3035_s24 }
  0xd9   : > { %p3039_p9 = pneg %p3038_p6  ;;  %p3045_p8 = por %p3044_p10, %p3043_p5 }
  0xdb   : > { %p3046_p12 = pnand %p3045_p8, %p3039_p9 }
  0xdd   : > { %3049 = shalt.err (!%p3046_p12)
}
  0xde   : > { %2746 = dma.hbm_to_vmem [thread:$0]  (!%p4641_p4), %s3835_s20, 2048, %s3838_s2, %s4585_s1, %s4643_s17, %s4643_s17, %s4586_s10  }
  0xdf   : > { %s3478_s15 = smov [#allocation22]   ;;  %s4645_s12 = sld [smem:[#allocation63_spill]] }
  0xe0   : > { %s512_s0 = sshll.u32 %s3478_s15, 4  ;;  %p4646_p11 = scmp.ne.s32.totalorder %s4634_s9, 0  ;;  %s513_s0 = int_to_ptr.vmem [resolvable:$true] %s512_s0 }
  0xe5   : > { %s3050_s24 = scalar_lea.hbm %s4645_s12, 128 }
  0xe6   : > { %p3051_p1 = scmp.ne.s32.totalorder %s4645_s12, %s3050_s24  ;;  %p3057_p13 = scmp.lt.u32.totalorder %s3050_s24, %s4645_s12 }
  0xe8   : > { %p3053_p2 = pnand %p3051_p1, %p4646_p11 }
  0xea   : > { %p3054_p3 = pneg %p3053_p2 }
  0xec   : > { %p3059_p7 = pnand %p3057_p13, %p3054_p3 }
  0xee   : > { %3062 = shalt.err (!%p3059_p7)
}
  0xef   : > { %s3063_s20 = scalar_lea.vmem %s513_s0, 128  ;;  %p3071_p10 = scmp.lt.s32.totalorder %s513_s0, %s513_s0 }
  0xf0   : > { %p3064_p6 = scmp.ne.s32.totalorder %s513_s0, %s3063_s20  ;;  %p3072_p8 = scmp.lt.s32.totalorder %s3063_s20, %s3063_s20 }
  0xf2   : > { %p3066_p9 = pnand %p3064_p6, %p4646_p11  ;;  %p3073_p12 = por %p3072_p8, %p3071_p10 }
  0xf4   : > { %p3067_p5 = pneg %p3066_p9 }
  0xf6   : > { %p3074_p4 = pnand %p3073_p12, %p3067_p5 }
  0xf8   : > { %3077 = shalt.err (!%p3074_p4)
}
  0xf9   : > { %p4647_p1 = scmp.ne.s32.totalorder %s4631_s18, 0  ;;  %s4648_s3 = sld [smem:[#allocation39_spill]] }
  0xfa   : > { %s4649_s9 = sld [smem:[#allocation38_spill]]  ;;  %s4588_s21 = sadd.s32 4294967294, %s3468_s28  }
  0xfb   : > { %s4650_s29 = sld [smem:[#allocation44_spill]]  ;;  %s60_s18 = sadd.s32 1, %s3460_s26 }
  0xfc   : > { %2721 = dma.hbm_to_vmem [thread:$0]  (!%p4647_p1), %s4645_s12, 128, %s513_s0, [#allocation21]  }
  0xfd   : > { %p61_p4 = scmp.ge.s32.totalorder %s60_s18, 2  ;;  %s63_s13 = sadd.s32 1, %s3464_s27 }
  0xfe   : > { %s72_s24 = sadd.s32 1, %s3448_s23  ;;  %p79_p11 = scmp.ne.s32.totalorder %s3448_s23, %s3444_s22 }
  0xff   : > { %s4711_s18 = smov (%p61_p4, %s60_s18), 0  ;;  %s4713_s13 = smov (!%p61_p4, %s63_s13), %s3464_s27 }
 0x100   : > { %4651 = sst [smem:[#allocation47_spill]] %s4711_s18  ;;  %s67_s14 = ssub.s32 %s3460_s26, %s4711_s18 }
 0x101   : > { %p4652_p2 = scmp.eq.s32.totalorder %s3468_s28, 0  ;;  %p65_p13 = scmp.ge.s32.totalorder %s4713_s13, 2 }
 0x102   : > { %p85_p7 = scmp.ne.s32.totalorder %s3444_s22, %s4648_s3  ;;  %s98_s0 = sadd.s32 1, %s4649_s9 }
 0x103   : > { %p3898_p3 = por %p4652_p2, %p79_p11  ;;  %p408_p6 = scmp.eq.s32.totalorder %s4650_s29, 3 }
 0x104   : > { %s4715_s13 = smov (%p65_p13, %s4713_s13), 0  ;;  %p4655_p9 = scmp.eq.s32.totalorder %s4650_s29, 0 }
 0x105   : > { %4654 = sst [smem:[#allocation48_spill]] %s4715_s13  ;;  %p3914_p10 = por %p408_p6, %p79_p11 }
 0x106   : > { %p3910_p5 = por %p4655_p9, %p85_p7  ;;  %s68_s15 = ssub.s32 %s3464_s27, %s4715_s13 }
 0x107   : > { %s4658_s2 = scalar_select %p3914_p10, 1, 0 }
 0x108   : > { %s4656_s20 = scalar_select %p3910_p5, 1, 0 }
 0x109   : > { %4659 = sst [smem:[#allocation50_spill]] %s4658_s2  ;;  %p414_p8 = scmp.eq.s32.totalorder %s4588_s21, 3 }
 0x10a   : > { %4657 = sst [smem:[#allocation49_spill]] %s4656_s20  ;;  %s69_s3 = sor.u32 %s68_s15, %s67_s14 }
 0x10b   : > { %p96_p12 = scmp.eq.s32.totalorder %s68_s15, 0  ;;  %p70_p1 = scmp.eq.s32.totalorder %s69_s3, 0 }
 0x10c   : > { %p3922_p4 = por %p414_p8, %p85_p7  ;;  %s523_s10 = sand.u32 1, %s3448_s23  }
 0x10d   : > { %s4717_s9 = smov (!%p96_p12, %s4649_s9), %s98_s0  ;;  %s2139_s5 = sshll.u32 %s3460_s26, 1 }
 0x10e   : > { %s4660_s29 = scalar_select %p3922_p4, 1, 0 }
 0x10f   : > { %s3930_s1 = scalar_select %p70_p1, %s3448_s23, %s72_s24  }
 0x110   : > { %s2138_s7 = sshll.u32 %s523_s10, 3  ;;  %s532_s12 = sadd.s32 %s3464_s27, %s2139_s5 }
 0x111   : > { %s2140_s21 = sshll.u32 %s532_s12, 7  ;;  %s527_s13 = scalar_lea.vmem [#allocation2], %s2138_s7 }
 0x112   : > { %s536_s18 = sshll.u32 %s527_s13, 4  ;;  %s4661_s15 = sld [smem:[#allocation51_spill]]  ;;  %s3940_s18 = int_to_ptr.vmem [resolvable:$true] %s536_s18 }
 0x113   : > { %p4662_p11 = scmp.lt.s32.totalorder %s3468_s28, 4  ;;  %s4664_s12 = sld [smem:[#allocation53_spill]] }
 0x114   : > { %s524_s2 = scalar_lea.sflag [#allocation3], %s523_s10 }
 0x115   : > { %p3946_p2 = pnand %p4662_p11, %p3898_p3 }
 0x117   : > { %p3080_p7 = pneg %p3946_p2 }
 0x118   : > { %s3938_s20 = scalar_lea.hbm %s4661_s15, %s2140_s21  ;;  %s567_s21 = scalar_lea.vmem [#allocation7], %s3715_s16 }
 0x119   : > { %s3954_s13 = scalar_lea.hbm %s4664_s12, %s3733_s4  ;;  %s574_s0 = sshll.u32 %s567_s21, 4  ;;  %s3957_s0 = int_to_ptr.vmem [resolvable:$true] %s574_s0 }
 0x11a   : > { %s3078_s3 = scalar_lea.hbm %s3938_s20, 128  ;;  %s3083_s5 = scalar_lea.hbm %s4661_s15, 512 }
 0x11b   : > { %p3079_p13 = scmp.ne.s32.totalorder %s3938_s20, %s3078_s3  ;;  %p3084_p9 = scmp.lt.u32.totalorder %s3938_s20, %s4661_s15 }
 0x11c   : > { %p3085_p8 = scmp.lt.u32.totalorder %s3083_s5, %s3078_s3  ;;  %p3087_p1 = scmp.lt.u32.totalorder %s3078_s3, %s3938_s20 }
 0x11d   : > { %p3081_p3 = pnand %p3080_p7, %p3079_p13 }
 0x11e   : > { %p3086_p12 = por %p3085_p8, %p3084_p9 }
 0x11f   : > { %p3082_p6 = pneg %p3081_p3 }
 0x120   : > { %p3088_p11 = por %p3087_p1, %p3086_p12 }
 0x122   : > { %p3089_p4 = pnand %p3088_p11, %p3082_p6 }
 0x124   : > { %3092 = shalt.err (!%p3089_p4)
}
 0x125   : > { %s3093_s10 = scalar_lea.vmem %s3940_s18, 128  ;;  %s3479_s21 = smov [#allocation2]  }
 0x126   : > { %p3094_p13 = scmp.ne.s32.totalorder %s3940_s18, %s3093_s10  ;;  %s3098_s6 = sshll.u32 %s3479_s21, 4  ;;  %s3099_s6 = int_to_ptr.vmem [resolvable:$false] %s3098_s6 }
 0x127   : > { %s3100_s27 = scalar_lea.vmem %s3099_s6, 256  ;;  %p3101_p5 = scmp.lt.s32.totalorder %s3940_s18, %s3099_s6 }
 0x128   : > { %p3096_p3 = pnand %p3094_p13, %p3080_p7  ;;  %p3102_p9 = scmp.lt.s32.totalorder %s3100_s27, %s3093_s10 }
 0x12a   : > { %p3097_p10 = pneg %p3096_p3  ;;  %p3103_p8 = por %p3102_p9, %p3101_p5 }
 0x12c   : > { %p3104_p12 = pnand %p3103_p8, %p3097_p10 }
 0x12e   : > { %3107 = shalt.err (!%p3104_p12)
}
 0x12f   : > { %2725 = dma.hbm_to_vmem [thread:$0]  (!%p3946_p2), %s3938_s20, 128, %s3940_s18, %s524_s2  }
 0x130   : > { %s3108_s3 = scalar_lea.hbm %s3954_s13, 16  ;;  %s3113_s7 = scalar_lea.hbm %s4664_s12, 32 }
 0x131   : > { %p3109_p4 = scmp.ne.s32.totalorder %s3954_s13, %s3108_s3  ;;  %p3114_p5 = scmp.lt.u32.totalorder %s3954_s13, %s4664_s12 }
 0x132   : > { %p3115_p10 = scmp.lt.u32.totalorder %s3113_s7, %s3108_s3  ;;  %p3117_p11 = scmp.lt.u32.totalorder %s3108_s3, %s3954_s13 }
 0x133   : > { %p3111_p7 = pnand %p3109_p4, %p3740_p0 }
 0x134   : > { %p3116_p1 = por %p3115_p10, %p3114_p5 }
 0x135   : > { %p3112_p6 = pneg %p3111_p7 }
 0x136   : > { %p3118_p13 = por %p3117_p11, %p3116_p1 }
 0x138   : > { %p3119_p3 = pnand %p3118_p13, %p3112_p6 }
 0x13a   : > { %3122 = shalt.err (!%p3119_p3)
}
 0x13b   : > { %s3123_s18 = scalar_lea.vmem %s3957_s0, 16  ;;  %s3480_s20 = smov [#allocation7]  }
 0x13c   : > { %p3124_p2 = scmp.ne.s32.totalorder %s3957_s0, %s3123_s18  ;;  %s3128_s24 = sshll.u32 %s3480_s20, 4  ;;  %s3129_s24 = int_to_ptr.vmem [resolvable:$false] %s3128_s24 }
 0x13d   : > { %s3130_s2 = scalar_lea.vmem %s3129_s24, 32  ;;  %p3131_p12 = scmp.lt.s32.totalorder %s3957_s0, %s3129_s24 }
 0x13e   : > { %p3126_p9 = pnand %p3124_p2, %p3740_p0  ;;  %p3132_p4 = scmp.lt.s32.totalorder %s3130_s2, %s3123_s18 }
 0x140   : > { %p3127_p8 = pneg %p3126_p9  ;;  %p3133_p7 = por %p3132_p4, %p3131_p12 }
 0x142   : > { %p3134_p5 = pnand %p3133_p7, %p3127_p8 }
 0x144   : > { %3137 = shalt.err (!%p3134_p5)
}
 0x145   : > { %p4665_p6 = scmp.ne.s32.totalorder %s4632_s25, 0  ;;  %s4666_s6 = scalar_lea.sflag [#allocation6], %s3712_s19 }
 0x146   : > { %s4667_s14 = sld [smem:[#allocation55_spill]]  ;;  %s602_s7 = scalar_lea.vmem [#allocation10], %s3718_s8 }
 0x147   : > { %2731 = dma.hbm_to_vmem [thread:$0]  (!%p4665_p6), %s3954_s13, 16, %s3957_s0, %s4666_s6  }
 0x148   : > { %s609_s10 = sshll.u32 %s602_s7, 4  ;;  %s4668_s20 = sld [smem:[#allocation57_spill]]  ;;  %s4014_s10 = int_to_ptr.vmem [resolvable:$true] %s609_s10 }
 0x14c   : > { %s4011_s5 = scalar_lea.hbm %s4667_s14, %s3721_s30  ;;  %s3143_s6 = scalar_lea.hbm %s4667_s14, 4096 }
 0x14d   : > { %s3138_s12 = scalar_lea.hbm %s4011_s5, 2048  ;;  %p3144_p13 = scmp.lt.u32.totalorder %s4011_s5, %s4667_s14 }
 0x14e   : > { %s4669_s2 = smov %s4668_s20  ;;  %s4020_s24 = scalar_lea.hbm %s4668_s20, %s3733_s4 }
 0x14f   : > { %p3139_p10 = scmp.ne.s32.totalorder %s4011_s5, %s3138_s12  ;;  %p3145_p3 = scmp.lt.u32.totalorder %s3143_s6, %s3138_s12 }
 0x150   : > { %p3147_p9 = scmp.lt.u32.totalorder %s3138_s12, %s4011_s5 }
 0x151   : > { %p3141_p1 = pnand %p3139_p10, %p3740_p0  ;;  %p3146_p2 = por %p3145_p3, %p3144_p13 }
 0x153   : > { %p3142_p11 = pneg %p3141_p1  ;;  %p3148_p8 = por %p3147_p9, %p3146_p2 }
 0x155   : > { %p3149_p12 = pnand %p3148_p8, %p3142_p11 }
 0x157   : > { %3152 = shalt.err (!%p3149_p12)
}
 0x158   : > { %s3153_s4 = scalar_lea.vmem %s4014_s10, 2048  ;;  %s3481_s7 = smov [#allocation10]  }
 0x159   : > { %p3154_p4 = scmp.ne.s32.totalorder %s4014_s10, %s3153_s4  ;;  %s3158_s21 = sshll.u32 %s3481_s7, 4  ;;  %s3159_s21 = int_to_ptr.vmem [resolvable:$false] %s3158_s21 }
 0x15a   : > { %s3160_s18 = scalar_lea.vmem %s3159_s21, 4096  ;;  %p3161_p10 = scmp.lt.s32.totalorder %s4014_s10, %s3159_s21 }
 0x15b   : > { %p3156_p7 = pnand %p3154_p4, %p3740_p0  ;;  %p3162_p1 = scmp.lt.s32.totalorder %s3160_s18, %s3153_s4 }
 0x15d   : > { %p3157_p5 = pneg %p3156_p7  ;;  %p3163_p13 = por %p3162_p1, %p3161_p10 }
 0x15f   : > { %p3164_p3 = pnand %p3163_p13, %p3157_p5 }
 0x161   : > { %3167 = shalt.err (!%p3164_p3)
}
 0x162   : > { %s4670_s12 = smov 8   ;;  %s4671_s20 = scalar_lea.sflag [#allocation9], %s3712_s19 }
 0x163   : > { %2737 = dma.hbm_to_vmem [thread:$0]  (!%p4665_p6), %s4011_s5, 2048, %s4014_s10, %s4671_s20, %s4643_s17, %s4643_s17, %s4670_s12  }
 0x164   : > { %s643_s13 = scalar_lea.vmem [#allocation13], %s3715_s16  ;;  %s4672_s3 = sld [smem:[#allocation59_spill]] }
 0x165   : > { %s650_s0 = sshll.u32 %s643_s13, 4  ;;  %s3168_s7 = scalar_lea.hbm %s4020_s24, 16  ;;  %s651_s0 = int_to_ptr.vmem [resolvable:$true] %s650_s0 }
 0x166   : > { %p3169_p11 = scmp.ne.s32.totalorder %s4020_s24, %s3168_s7  ;;  %s3173_s14 = scalar_lea.hbm %s4669_s2, 32 }
 0x167   : > { %p3174_p8 = scmp.lt.u32.totalorder %s4020_s24, %s4669_s2  ;;  %p3175_p12 = scmp.lt.u32.totalorder %s3173_s14, %s3168_s7 }
 0x168   : > { %p3171_p2 = pnand %p3169_p11, %p3740_p0  ;;  %p3177_p7 = scmp.lt.u32.totalorder %s3168_s7, %s4020_s24 }
 0x169   : > { %p3176_p4 = por %p3175_p12, %p3174_p8 }
 0x16a   : > { %s4053_s4 = scalar_lea.hbm %s4672_s3, %s3721_s30  ;;  %p3172_p9 = pneg %p3171_p2 }
 0x16b   : > { %p3178_p5 = por %p3177_p7, %p3176_p4 }
 0x16d   : > { %p3179_p10 = pnand %p3178_p5, %p3172_p9 }
 0x16f   : > { %3182 = shalt.err (!%p3179_p10)
}
 0x170   : > { %s3183_s16 = scalar_lea.vmem %s651_s0, 16  ;;  %s3482_s5 = smov [#allocation13]  }
 0x171   : > { %p3184_p1 = scmp.ne.s32.totalorder %s651_s0, %s3183_s16  ;;  %s3188_s10 = sshll.u32 %s3482_s5, 4  ;;  %s3189_s10 = int_to_ptr.vmem [resolvable:$false] %s3188_s10 }
 0x172   : > { %s3190_s20 = scalar_lea.vmem %s3189_s10, 32  ;;  %p3191_p11 = scmp.lt.s32.totalorder %s651_s0, %s3189_s10 }
 0x173   : > { %p3186_p13 = pnand %p3184_p1, %p3740_p0  ;;  %p3192_p2 = scmp.lt.s32.totalorder %s3190_s20, %s3183_s16 }
 0x175   : > { %p3187_p3 = pneg %p3186_p13  ;;  %p3193_p6 = por %p3192_p2, %p3191_p11 }
 0x177   : > { %p3194_p8 = pnand %p3193_p6, %p3187_p3 }
 0x179   : > { %3197 = shalt.err (!%p3194_p8)
}
 0x17a   : > { %p4673_p12 = scmp.ne.s32.totalorder %s4632_s25, 0  ;;  %s4674_s26 = scalar_lea.sflag [#allocation12], %s3712_s19 }
 0x17b   : > { %s682_s15 = scalar_lea.vmem [#allocation16], %s3718_s8  ;;  %s3198_s13 = scalar_lea.hbm %s4053_s4, 2048 }
 0x17c   : > { %2743 = dma.hbm_to_vmem [thread:$0]  (!%p4673_p12), %s4020_s24, 16, %s651_s0, %s4674_s26  }
 0x17d   : > { %s689_s14 = sshll.u32 %s682_s15, 4  ;;  %p3199_p9 = scmp.ne.s32.totalorder %s4053_s4, %s3198_s13  ;;  %s4075_s14 = int_to_ptr.vmem [resolvable:$true] %s689_s14 }
 0x17e   : > { %s3203_s7 = scalar_lea.hbm %s4672_s3, 4096  ;;  %p3204_p7 = scmp.lt.u32.totalorder %s4053_s4, %s4672_s3 }
 0x17f   : > { %p3201_p6 = pnand %p3199_p9, %p3740_p0  ;;  %p3205_p5 = scmp.lt.u32.totalorder %s3203_s7, %s3198_s13 }
 0x180   : > { %p3207_p1 = scmp.lt.u32.totalorder %s3198_s13, %s4053_s4 }
 0x181   : > { %p3202_p4 = pneg %p3201_p6  ;;  %p3206_p10 = por %p3205_p5, %p3204_p7 }
 0x183   : > { %p3208_p13 = por %p3207_p1, %p3206_p10 }
 0x185   : > { %p3209_p3 = pnand %p3208_p13, %p3202_p4 }
 0x187   : > { %3212 = shalt.err (!%p3209_p3)
}
 0x188   : > { %s3213_s24 = scalar_lea.vmem %s4075_s14, 2048  ;;  %s3483_s0 = smov [#allocation16]  }
 0x189   : > { %p3214_p11 = scmp.ne.s32.totalorder %s4075_s14, %s3213_s24  ;;  %s3218_s16 = sshll.u32 %s3483_s0, 4  ;;  %s3219_s16 = int_to_ptr.vmem [resolvable:$false] %s3218_s16 }
 0x18a   : > { %s3220_s5 = scalar_lea.vmem %s3219_s16, 4096  ;;  %p3221_p9 = scmp.lt.s32.totalorder %s4075_s14, %s3219_s16 }
 0x18b   : > { %p3216_p2 = pnand %p3214_p11, %p3740_p0  ;;  %p3222_p6 = scmp.lt.s32.totalorder %s3220_s5, %s3213_s24 }
 0x18d   : > { %p3217_p8 = pneg %p3216_p2  ;;  %p3223_p7 = por %p3222_p6, %p3221_p9 }
 0x18f   : > { %p3224_p5 = pnand %p3223_p7, %p3217_p8 }
 0x191   : > { %3227 = shalt.err (!%p3224_p5)
}
 0x192   : > { %s4675_s10 = scalar_lea.sflag [#allocation15], %s3712_s19  ;;  %s4676_s15 = sld [smem:[#allocation60_spill]] }
 0x193   : > { %2749 = dma.hbm_to_vmem [thread:$0]  (!%p4673_p12), %s4053_s4, 2048, %s4075_s14, %s4675_s10, %s4643_s17, %s4643_s17, %s4670_s12  }
 0x194   : > { %s703_s6 = scalar_lea.vmem [#allocation17], %s3718_s8  ;;  %s700_s7 = scalar_lea.sflag [#allocation18], %s3712_s19 }
 0x195   : > { %s710_s27 = sshll.u32 %s703_s6, 4  ;;  %s4110_s27 = int_to_ptr.vmem [resolvable:$true] %s710_s27 }
 0x198   : > { %s4107_s13 = scalar_lea.hbm %s4676_s15, %s3721_s30  ;;  %s3233_s18 = scalar_lea.hbm %s4676_s15, 4096 }
 0x199   : > { %s3228_s21 = scalar_lea.hbm %s4107_s13, 2048  ;;  %p3234_p13 = scmp.lt.u32.totalorder %s4107_s13, %s4676_s15 }
 0x19a   : > { %p3229_p4 = scmp.ne.s32.totalorder %s4107_s13, %s3228_s21  ;;  %p3235_p3 = scmp.lt.u32.totalorder %s3233_s18, %s3228_s21 }
 0x19b   : > { %p3237_p2 = scmp.lt.u32.totalorder %s3228_s21, %s4107_s13 }
 0x19c   : > { %p3231_p10 = pnand %p3229_p4, %p3740_p0  ;;  %p3236_p11 = por %p3235_p3, %p3234_p13 }
 0x19e   : > { %p3232_p1 = pneg %p3231_p10  ;;  %p3238_p8 = por %p3237_p2, %p3236_p11 }
 0x1a0   : > { %p3239_p9 = pnand %p3238_p8, %p3232_p1 }
 0x1a2   : > { %3242 = shalt.err (!%p3239_p9)
}
 0x1a3   : > { %s3243_s8 = scalar_lea.vmem %s4110_s27, 2048  ;;  %s3484_s0 = smov [#allocation17]  }
 0x1a4   : > { %p3244_p6 = scmp.ne.s32.totalorder %s4110_s27, %s3243_s8  ;;  %s3248_s16 = sshll.u32 %s3484_s0, 4  ;;  %s3249_s16 = int_to_ptr.vmem [resolvable:$false] %s3248_s16 }
 0x1a5   : > { %s3250_s5 = scalar_lea.vmem %s3249_s16, 4096  ;;  %p3251_p4 = scmp.lt.s32.totalorder %s4110_s27, %s3249_s16 }
 0x1a6   : > { %p3246_p7 = pnand %p3244_p6, %p3740_p0  ;;  %p3252_p10 = scmp.lt.s32.totalorder %s3250_s5, %s3243_s8 }
 0x1a8   : > { %p3247_p5 = pneg %p3246_p7  ;;  %p3253_p13 = por %p3252_p10, %p3251_p4 }
 0x1aa   : > { %p3254_p3 = pnand %p3253_p13, %p3247_p5 }
 0x1ac   : > { %3257 = shalt.err (!%p3254_p3)
}
 0x1ad   : > { %2752 = dma.hbm_to_vmem [thread:$0]  (!%p4673_p12), %s4107_s13, 2048, %s4110_s27, %s700_s7, %s4643_s17, %s4643_s17, %s4670_s12  }
 0x1ae   : > { %s4677_s11 = sld [smem:[#allocation46_spill]] }
 0x1b4   : > { %p4678_p0 = scmp.ne.s32.totalorder %s4677_s11, 0 }
 0x1b5   : > { %s4679_s10 = sld [smem:[#allocation49_spill]] (!%p4678_p0)  ;;  %s4142_s20 = sand.u32 (!%p4678_p0), 1, %s3444_s22  }
 0x1b6   : > { %722 = sbr.rel (%p4678_p0) target bundleno = 2335 (0x91f), region = 72  ;;  %s4145_s26 = sshll.u32 (!%p4678_p0), %s4142_s20, 3 }
 0x1b7   : > { %s725_s25 = scalar_lea.sflag (!%p4678_p0), [#allocation3], %s4142_s20  ;;  %s728_s6 = scalar_lea.vmem (!%p4678_p0), [#allocation2], %s4145_s26 }
 0x1bb   : > { %p4680_p1 = scmp.ne.s32.totalorder (!%p4678_p0), %s4679_s10, 0 }
 0x1bd   : > { %3387 = dma.done.wait (%p4680_p1), %s725_s25, 128  }
 0x1be   : > { %3389 = vsyncadd (%p4680_p1), %s725_s25, 4294967168  ;;  %s4681_s19 = sld [smem:[#allocation44_spill]]  ;;  %s4682_s17 = sld [smem:[#allocation37_spill]] }
 0x1bf   : > { %s4683_s12 = sld [smem:[#allocation45_spill]] }
 0x1c4   : > { %s4154_s13 = sand.u32 1, %s4681_s19   ;;  %s4157_s27 = sand.u32 1, %s4682_s17  }
 0x1c5   : > { %s2164_s7 = sshll.u32 %s4157_s27, 7  ;;  %s734_s21 = scalar_lea.sflag [#allocation6], %s4154_s13 }
 0x1c6   : > { %s4161_s4 = scalar_lea.vmem [#allocation5], %s2164_s7  ;;  %p4684_p12 = scmp.ne.s32.totalorder %s4683_s12, 0 }
 0x1c8   : > { %3391 = dma.done.wait (%p4684_p12), %s734_s21, 2064  }
 0x1c9   : > { %3393 = vsyncadd (%p4684_p12), %s734_s21, 4294965232  ;;  %s745_s14 = scalar_lea.vmem [#allocation7], %s4157_s27  ;;  %s751_s18 = scalar_lea.sflag [#allocation9], %s4154_s13 }
 0x1ca   : > { %s753_s30 = scalar_lea.vmem [#allocation8], %s4157_s27 }
 0x1cb   : > { %3395 = dma.done.wait (%p4684_p12), %s751_s18, 2064  }
 0x1cc   : > { %3397 = vsyncadd (%p4684_p12), %s751_s18, 4294965232  ;;  %s4174_s24 = scalar_lea.vmem [#allocation10], %s2164_s7  ;;  %s768_s8 = scalar_lea.sflag [#allocation12], %s4154_s13 }
 0x1cd   : > { %s4177_s0 = scalar_lea.vmem [#allocation11], %s2164_s7 }
 0x1ce   : > { %3399 = dma.done.wait (%p4684_p12), %s768_s8, 2064  }
 0x1cf   : > { %3401 = vsyncadd (%p4684_p12), %s768_s8, 4294965232  ;;  %s779_s16 = scalar_lea.vmem [#allocation13], %s4157_s27  ;;  %s785_s5 = scalar_lea.sflag [#allocation15], %s4154_s13 }
 0x1d0   : > { %s4185_s11 = scalar_lea.vmem [#allocation14], %s2164_s7 }
 0x1d1   : > { %3403 = dma.done.wait (%p4684_p12), %s785_s5, 4096  }
 0x1d2   : > { %3405 = vsyncadd (%p4684_p12), %s785_s5, 4294963200  ;;  %s4191_s10 = scalar_lea.vmem [#allocation16], %s2164_s7  ;;  %s803_s25 = scalar_lea.sflag [#allocation18], %s4154_s13 }
 0x1d3   : > { %s4194_s17 = scalar_lea.vmem [#allocation17], %s2164_s7 }
 0x1d4   : > { %3407 = dma.done.wait (%p4684_p12), %s803_s25, 2048  }
 0x1d5   : > { %3409 = vsyncadd (%p4684_p12), %s803_s25, 4294965248  ;;  %p4685_p11 = scmp.eq.s32.totalorder %s4681_s19, 0 }
 0x1d7   : > { %3411 = dma.done.wait (%p4685_p11), [#allocation18], 128   ;;  %p4686_p2 = pmov %p4685_p11 }
 0x1d9   : > { %3413 = vsyncadd (%p4686_p2), [#allocation18], 4294967168  ;;  %p4687_p8 = pmov %p4686_p2 }
 0x1da   : > { %p4688_p9 = pmov %p4686_p2 }
 0x1db   : > { %3415 = dma.done.wait (%p4687_p8), [#allocation21], 256  }
 0x1dc   : > { %3417 = vsyncadd (%p4688_p9), [#allocation21], 4294967040  ;;  %v3485_v0 = vmov 0.0|0.0   ;;  %vm3486_vm0 = vmmov 0   ;;  %v3487_v1 = vmov 0.0   ;;  %v920_v2 = vld [vmem:[%s4161_s4] sm:$0xff] }
 0x1dd   : > { %2530 = vmatprep.subr.bf16.mxu0 %v3485_v0  ;;  %2337 = vmatprep.mubr.msk.f32.mxu0 %vm3486_vm0, %v3487_v1  ;;  %v921_v3 = vld [vmem:[%s4161_s4 + $0x8] sm:$0xff]  ;;  %v922_v4 = vld [vmem:[%s4161_s4 + $0x10] sm:$0xff]  ;;  %v923_v6 = vld [vmem:[%s4161_s4 + $0x18] sm:$0xff]  ;;  %s909_s19 = scalar_lea.vmem [#allocation24], %s4145_s26  ;;  %s916_s12 = scalar_lea.vmem [#allocation26], %s4145_s26  ;;  %vm1451_vm1 = vcmask 64512  }
 0x1de   : > { %2554 = vmatprep.subr.bf16.mxu1 %v3485_v0  ;;  %2372 = vmatprep.mubr.msk.f32.mxu1 %vm3486_vm0, %v3487_v1  ;;  %v2531_v5 = vpack.c.bf16 %v921_v3, %v920_v2  ;;  %v2534_v7 = vpack.c.bf16 %v923_v6, %v922_v4  ;;  %v924_v8 = vld [vmem:[%s4161_s4 + $0x20] sm:$0xff]  ;;  %v925_v9 = vld [vmem:[%s4161_s4 + $0x28] sm:$0xff]  ;;  %v926_v11 = vld [vmem:[%s4161_s4 + $0x30] sm:$0xff]  ;;  %s4689_s27 = sld [smem:[#allocation40_spill]]  ;;  %s4690_s7 = sld [smem:[#allocation41_spill]] }
 0x1df   : > { %v2537_v10 = vpack.c.bf16 %v925_v9, %v924_v8  ;;  %v927_v12 = vld [vmem:[%s4161_s4 + $0x38] sm:$0xff]  ;;  %v928_v14 = vld [vmem:[%s4161_s4 + $0x40] sm:$0xff]  ;;  %v929_v15 = vld [vmem:[%s4161_s4 + $0x48] sm:$0xff]  ;;  %s4691_s21 = sld [smem:[#allocation50_spill]]  ;;  %s1717_s5 = scalar_lea.sflag [#allocation25], %s4154_s13 }
 0x1e0   : > { %2532 = vmatpush3.bf16.msra.mxu0 %v2531_v5  ;;  %v2540_v13 = vpack.c.bf16 %v927_v12, %v926_v11  ;;  %v2543_v16 = vpack.c.bf16 %v929_v15, %v928_v14  ;;  %v930_v17 = vld [vmem:[%s4161_s4 + $0x50] sm:$0xff]  ;;  %v931_v18 = vld [vmem:[%s4161_s4 + $0x58] sm:$0xff]  ;;  %v932_v20 = vld [vmem:[%s4161_s4 + $0x60] sm:$0xff] }
 0x1e1   : > { %2533 = vmatprep.subr.bf16.mxu0 %v3485_v0  ;;  %v2546_v19 = vpack.c.bf16 %v931_v18, %v930_v17  ;;  %v933_v21 = vld [vmem:[%s4161_s4 + $0x68] sm:$0xff]  ;;  %v934_v23 = vld [vmem:[%s4161_s4 + $0x70] sm:$0xff]  ;;  %v935_v24 = vld [vmem:[%s4161_s4 + $0x78] sm:$0xff] }
 0x1e2   : > { %v2549_v22 = vpack.c.bf16 %v933_v21, %v932_v20  ;;  %v2552_v25 = vpack.c.bf16 %v935_v24, %v934_v23  ;;  %v4239_v26 = vld [vmem:[%s728_s6] sm:$0xff]  ;;  %v1034_v29 = vld [vmem:[%s4174_s24] sm:$0xff]  ;;  %s3488_s6 = smov 64  }
 0x1e3   : > { %v1035_v30 = vld [vmem:[%s4174_s24 + $0x8] sm:$0xff]  ;;  %v1036_v31 = vld [vmem:[%s4174_s24 + $0x10] sm:$0xff]  ;;  %v1037_v33 = vld [vmem:[%s4174_s24 + $0x18] sm:$0xff] }
 0x1e4   : > { %2535 = vmatpush3.bf16.msra.mxu0 %v2534_v7  ;;  %v2555_v32 = vpack.c.bf16 %v1035_v30, %v1034_v29  ;;  %v2558_v34 = vpack.c.bf16 %v1037_v33, %v1036_v31  ;;  %v1038_v35 = vld [vmem:[%s4174_s24 + $0x20] sm:$0xff]  ;;  %v1039_v36 = vld [vmem:[%s4174_s24 + $0x28] sm:$0xff]  ;;  %v1040_v39 = vld [vmem:[%s4174_s24 + $0x30] sm:$0xff]  ;;  %s2183_s4 = sshll.u32 %s4689_s27, 1 }
 0x1e5   : > { %2536 = vmatprep.subr.bf16.mxu0 %v3485_v0  ;;  %v1125_v37 = vld [vmem:[%s4177_s0] sm:$0xff]  ;;  %v2561_v38 = vpack.c.bf16 %v1039_v36, %v1038_v35  ;;  %v1126_v40 = vld [vmem:[%s4177_s0 + $0x8] sm:$0xff]  ;;  %v1041_v41 = vld [vmem:[%s4174_s24 + $0x38] sm:$0xff]  ;;  %p4693_p7 = scmp.ne.s32.totalorder %s4691_s21, 0 }
 0x1e6   : > { %2556 = vmatpush3.bf16.msra.mxu1 %v2555_v32  ;;  %v2579_v42 = vpack.c.bf16 %v1126_v40, %v1125_v37  ;;  %v1127_v43 = vld [vmem:[%s4177_s0 + $0x10] sm:$0xff]  ;;  %v1128_v44 = vld [vmem:[%s4177_s0 + $0x18] sm:$0xff]  ;;  %v2564_v46 = vpack.c.bf16 %v1041_v41, %v1040_v39  ;;  %v1129_v47 = vld [vmem:[%s4177_s0 + $0x20] sm:$0xff] }
 0x1e7   : > { %2557 = vmatprep.subr.bf16.mxu1 %v3485_v0  ;;  %v2582_v45 = vpack.c.bf16 %v1128_v44, %v1127_v43  ;;  %v1130_v48 = vld [vmem:[%s4177_s0 + $0x28] sm:$0xff]  ;;  %v1042_v49 = vld [vmem:[%s4174_s24 + $0x40] sm:$0xff]  ;;  %v1044_v53 = vld [vmem:[%s4174_s24 + $0x50] sm:$0xff] }
 0x1e8   : > { %2538 = vmatpush3.bf16.msra.mxu0 %v2537_v10  ;;  %v1043_v50 = vld [vmem:[%s4174_s24 + $0x48] sm:$0xff]  ;;  %v2585_v51 = vpack.c.bf16 %v1130_v48, %v1129_v47  ;;  %v1045_v54 = vld [vmem:[%s4174_s24 + $0x58] sm:$0xff]  ;;  %v1046_v56 = vld [vmem:[%s4174_s24 + $0x60] sm:$0xff] }
 0x1e9   : > { %2539 = vmatprep.subr.bf16.mxu0 %v3485_v0  ;;  %v2567_v52 = vpack.c.bf16 %v1043_v50, %v1042_v49  ;;  %v2570_v55 = vpack.c.bf16 %v1045_v54, %v1044_v53  ;;  %v1047_v57 = vld [vmem:[%s4174_s24 + $0x68] sm:$0xff]  ;;  %v1048_v59 = vld [vmem:[%s4174_s24 + $0x70] sm:$0xff]  ;;  %v1049_v60 = vld [vmem:[%s4174_s24 + $0x78] sm:$0xff] }
 0x1ea   : > { %2559 = vmatpush3.bf16.msra.mxu1 %v2558_v34  ;;  %v2573_v58 = vpack.c.bf16 %v1047_v57, %v1046_v56  ;;  %v2576_v61 = vpack.c.bf16 %v1049_v60, %v1048_v59  ;;  %v1223_v62 = vld [vmem:[%s4185_s11] sm:$0xff]  ;;  %v1224_v63 = vld [vmem:[%s4185_s11 + $0x8] sm:$0xff]  ;;  %v1225_v3 = vld [vmem:[%s4185_s11 + $0x10] sm:$0xff] }
 0x1eb   : > { %2560 = vmatprep.subr.bf16.mxu1 %v3485_v0  ;;  %v2603_v2 = vpack.c.bf16 %v1224_v63, %v1223_v62  ;;  %v1226_v4 = vld [vmem:[%s4185_s11 + $0x18] sm:$0xff]  ;;  %v1227_v6 = vld [vmem:[%s4185_s11 + $0x20] sm:$0xff]  ;;  %v1228_v7 = vld [vmem:[%s4185_s11 + $0x28] sm:$0xff] }
 0x1ec   : > { %2541 = vmatpush3.bf16.msra.mxu0 %v2540_v13  ;;  %v2606_v5 = vpack.c.bf16 %v1226_v4, %v1225_v3  ;;  %v2609_v8 = vpack.c.bf16 %v1228_v7, %v1227_v6  ;;  %v1229_v9 = vld [vmem:[%s4185_s11 + $0x30] sm:$0xff]  ;;  %v1230_v10 = vld [vmem:[%s4185_s11 + $0x38] sm:$0xff]  ;;  %v1232_v17 = vld [vmem:[%s4185_s11 + $0x48] sm:$0xff] }
 0x1ed   : > { %2542 = vmatprep.subr.bf16.mxu0 %v3485_v0  ;;  %v2612_v11 = vpack.c.bf16 %v1230_v10, %v1229_v9  ;;  %v1132_v20 = vld [vmem:[%s4177_s0 + $0x38] sm:$0xff]  ;;  %v1235_v29 = vld [vmem:[%s4185_s11 + $0x60] sm:$0xff]  ;;  %v1236_v30 = vld [vmem:[%s4185_s11 + $0x68] sm:$0xff] }
 0x1ee   : > { %2562 = vmatpush3.bf16.msra.mxu1 %v2561_v38  ;;  %v1234_v23 = vld [vmem:[%s4185_s11 + $0x58] sm:$0xff]  ;;  %v1135_v31 = vld [vmem:[%s4177_s0 + $0x50] sm:$0xff]  ;;  %v2621_v32 = vpack.c.bf16 %v1236_v30, %v1235_v29  ;;  %v1138_v38 = vld [vmem:[%s4177_s0 + $0x68] sm:$0xff] }
 0x1ef   : > { %2563 = vmatprep.subr.bf16.mxu1 %v3485_v0  ;;  %v1136_v33 = vld [vmem:[%s4177_s0 + $0x58] sm:$0xff]  ;;  %v1137_v37 = vld [vmem:[%s4177_s0 + $0x60] sm:$0xff]  ;;  %v1139_v41 = vld [vmem:[%s4177_s0 + $0x70] sm:$0xff] }
 0x1f0   : > { %2544 = vmatpush3.bf16.msra.mxu0 %v2543_v16  ;;  %v1231_v16 = vld [vmem:[%s4185_s11 + $0x40] sm:$0xff]  ;;  %v1237_v34 = vld [vmem:[%s4185_s11 + $0x70] sm:$0xff]  ;;  %v1238_v35 = vld [vmem:[%s4185_s11 + $0x78] sm:$0xff]  ;;  %v2594_v36 = vpack.c.bf16 %v1136_v33, %v1135_v31  ;;  %v2597_v40 = vpack.c.bf16 %v1138_v38, %v1137_v37 }
 0x1f1   : > { %2545 = vmatprep.subr.bf16.mxu0 %v3485_v0  ;;  %v2615_v18 = vpack.c.bf16 %v1232_v17, %v1231_v16  ;;  %v2624_v39 = vpack.c.bf16 %v1238_v35, %v1237_v34  ;;  %v918_v54 = vld [vmem:[#allocation20] sm:$0xff]  ;;  %v1463_v4 = vld [vmem:[%s4191_s10] sm:$0xff]  ;;  %v1469_v17 = vld [vmem:[%s4191_s10 + $0x30] sm:$0xff] }
 0x1f2   : > { %2565 = vmatpush3.bf16.msra.mxu1 %v2564_v46  ;;  %v2178_v62 = vld [vmem:[%s779_s16] ss:$0 sm:$0xff]  ;;  %v1477_v30 = vld [vmem:[%s4191_s10 + $0x70] sm:$0xff]  ;;  %v1478_v31 = vld [vmem:[%s4191_s10 + $0x78] sm:$0xff] }
 0x1f3   : > { %2566 = vmatprep.subr.bf16.mxu1 %v3485_v0 }
 0x1f4   : > { %2547 = vmatpush3.bf16.msra.mxu0 %v2546_v19  ;;  %v1131_v19 = vld [vmem:[%s4177_s0 + $0x30] sm:$0xff] }
 0x1f5   : > { %2548 = vmatprep.subr.bf16.mxu0 %v3485_v0  ;;  %v2588_v21 = vpack.c.bf16 %v1132_v20, %v1131_v19  ;;  %v1471_v20 = vld [vmem:[%s4191_s10 + $0x40] sm:$0xff] }
 0x1f6   : > { %2568 = vmatpush3.bf16.msra.mxu1 %v2567_v52 }
 0x1f7   : > { %2569 = vmatprep.subr.bf16.mxu1 %v3485_v0 }
 0x1f8   : > { %2550 = vmatpush3.bf16.msra.mxu0 %v2549_v22  ;;  %v1233_v22 = vld [vmem:[%s4185_s11 + $0x50] sm:$0xff] }
 0x1f9   : > { %2551 = vmatprep.subr.bf16.mxu0 %v3485_v0  ;;  %v2618_v24 = vpack.c.bf16 %v1234_v23, %v1233_v22  ;;  %v1473_v23 = vld [vmem:[%s4191_s10 + $0x50] sm:$0xff] }
 0x1fa   : > { %2571 = vmatpush3.bf16.msra.mxu1 %v2570_v55  ;;  %v919_v55 = vld [vmem:[#allocation19] sm:$0xff] }
 0x1fb   : > { %2572 = vmatprep.subr.bf16.mxu1 %v3485_v0 }
 0x1fc   : > { %2553 = vmatpush3.bf16.msra.mxu0 %v2552_v25  ;;  %v1133_v25 = vld [vmem:[%s4177_s0 + $0x40] sm:$0xff] }
 0x1fd   : > { %2578 = vmatprep.subr.bf16.mxu0 %v3485_v0 }
 0x1fe   : > { %2574 = vmatpush3.bf16.msra.mxu1 %v2573_v58 }
 0x1ff   : > { %2338 = vmatmul.mubr.f32.vlgmr.msra.gmra.mrb[0].mxu0 %v4239_v26  ;;  %2575 = vmatprep.subr.bf16.mxu1 %v3485_v0 }
 0x200   : > { %2407 = vmatprep.mubr.msk.f32.mxu0 %vm3486_vm0, %v3487_v1  ;;  %2580 = vmatpush3.bf16.msra.mxu0 %v2579_v42  ;;  %v1140_v42 = vld [vmem:[%s4177_s0 + $0x78] sm:$0xff] }
 0x201   : > { %2581 = vmatprep.subr.bf16.mxu0 %v3485_v0  ;;  %v2600_v43 = vpack.c.bf16 %v1140_v42, %v1139_v41 }
 0x202   : > { %2577 = vmatpush3.bf16.msra.mxu1 %v2576_v61 }
 0x203   : > { %2602 = vmatprep.subr.bf16.mxu1 %v3485_v0 }
 0x204   : > { %2583 = vmatpush3.bf16.msra.mxu0 %v2582_v45 }
 0x205   : > { %2584 = vmatprep.subr.bf16.mxu0 %v3485_v0  ;;  %2373 = vmatmul.mubr.f32.vlgmr.msra.gmra.mrb[0].mxu1 %v4239_v26 }
 0x206   : > { %2604 = vmatpush3.bf16.msra.mxu1 %v2603_v2  ;;  %2442 = vmatprep.mubr.msk.f32.mxu1 %vm3486_vm0, %v3487_v1 }
 0x207   : > { %2605 = vmatprep.subr.bf16.mxu1 %v3485_v0 }
 0x208   : > { %2586 = vmatpush3.bf16.msra.mxu0 %v2585_v51  ;;  %v2177_v51 = vld [vmem:[%s753_s30] ss:$0 sm:$0xff]  ;;  %s1752_s30 = sshll.u32 %s909_s19, 4  ;;  %s1753_s30 = int_to_ptr.vmem [resolvable:$true] %s1752_s30 }
 0x209   : > { %2587 = vmatprep.subr.bf16.mxu0 %v3485_v0  ;;  %s3258_s11 = scalar_lea.vmem %s1753_s30, 128 }
 0x20a   : > { %2607 = vmatpush3.bf16.msra.mxu1 %v2606_v5  ;;  %v1464_v5 = vld [vmem:[%s4191_s10 + $0x8] sm:$0xff]  ;;  %p3259_p6 = scmp.ne.s32.totalorder %s1753_s30, %s3258_s11 }
 0x20b   : > { %2608 = vmatprep.subr.bf16.mxu1 %v3485_v0  ;;  %v2627_v9 = vpack.c.bf16 %v1464_v5, %v1463_v4  ;;  %v1634_v5 = vld [vmem:[%s4194_s17 + $0x60] sm:$0xff] }
 0x20c   : > { %2589 = vmatpush3.bf16.msra.mxu0 %v2588_v21  ;;  %v1472_v21 = vld [vmem:[%s4191_s10 + $0x48] sm:$0xff]  ;;  %p3260_p5 = pnand %p3259_p6, %p4693_p7 }
 0x20d   : > { %2590 = vmatprep.subr.bf16.mxu0 %v3485_v0  ;;  %v2639_v22 = vpack.c.bf16 %v1472_v21, %v1471_v20 }
 0x20e   : > { %2610 = vmatpush3.bf16.msra.mxu1 %v2609_v8  ;;  %p3261_p4 = pneg %p3260_p5 }
 0x20f   : > { %2611 = vmatprep.subr.bf16.mxu1 %v3485_v0 }
 0x212   : > { %2613 = vmatpush3.bf16.msra.mxu1 %v2612_v11  ;;  %v1465_v11 = vld [vmem:[%s4191_s10 + $0x10] sm:$0xff] }
 0x213   : > { %2614 = vmatprep.subr.bf16.mxu1 %v3485_v0 }
 0x216   : > { %2616 = vmatpush3.bf16.msra.mxu1 %v2615_v18  ;;  %v1470_v18 = vld [vmem:[%s4191_s10 + $0x38] sm:$0xff] }
 0x217   : > { %2617 = vmatprep.subr.bf16.mxu1 %v3485_v0  ;;  %v2636_v19 = vpack.c.bf16 %v1470_v18, %v1469_v17 }
 0x21a   : > { %2619 = vmatpush3.bf16.msra.mxu1 %v2618_v24  ;;  %v1474_v24 = vld [vmem:[%s4191_s10 + $0x58] sm:$0xff] }
 0x21b   : > { %2620 = vmatprep.subr.bf16.mxu1 %v3485_v0 }
 0x21e   : > { %2622 = vmatpush3.bf16.msra.mxu1 %v2621_v32  ;;  %v2648_v32 = vpack.c.bf16 %v1478_v31, %v1477_v30 }
 0x21f   : > { %2623 = vmatprep.subr.bf16.mxu1 %v3485_v0 }
 0x222   : > { %2625 = vmatpush3.bf16.msra.mxu1 %v2624_v39 }
 0x223   : > { %2450 = vmatprep.subr.mxu1 %v3487_v1 }
 0x225   : > { %2443 = vmatmul.mubr.f32.vlgmr.msra.gmra.mrb[2].mxu1 %v4239_v26  ;;  %v2176_v26 = vld [vmem:[%s745_s14] ss:$0 sm:$0xff]  ;;  %s1733_s14 = sadd.s32 %s4690_s7, %s2183_s4 }
 0x226   : > { %2452 = vmatprep.mubr.msk.f32.mxu1 %vm3486_vm0, %v3487_v1  ;;  %s4409_s18 = sshll.u32 %s1733_s14, 7 }
 0x2d2   : > { %v4245_v27 = vpop.f32.mrb[0].mxu0 }
 0x2d3   : > { %1006 = vadd.xlane.f32.xlu0 %v4245_v27  ;;  %v2339_v28 = vpop.f32.mrb[1].mxu0 }
 0x2d8   : > { %v1116_v44 = vpop.f32.mrb[0].mxu1 }
 0x2d9   : > { %1121 = vrot.lane.b32.xlu1 %v1116_v44, %s3488_s6  ;;  %v2374_v45 = vpop.f32.mrb[1].mxu1  ;;  %v1120_v56 = vmul.f32 %v1116_v44, %v918_v54 }
 0x2f8   : > { %v1305_v60 = vpop.f32.mrb[2].mxu1 }
 0x2f9   : > { %v2444_v61 = vpop.f32.mrb[3].mxu1 }
 0x34b   : > { %v1122_v57 = vpop.permute.xlu1 %1121 }
 0x34c   : > { %v1123_v58 = vmul.f32 %v1122_v57, %v919_v55  ;;  %v1627_v57 = vld [vmem:[%s4194_s17 + $0x28] sm:$0xff] }
 0x34e   : > { %v1124_v59 = vadd.f32 %v1123_v58, %v1120_v56  ;;  %v1626_v56 = vld [vmem:[%s4194_s17 + $0x20] sm:$0xff] }
 0x34f   : > { %v2657_v58 = vpack.c.bf16 %v1627_v57, %v1626_v56 }
 0x350   : > { %1710 = vst [vmem:[%s916_s12] sm:$0xff] %v1124_v59 }
 0x360   : > { %v1007_v12 = vpop.xlane.xlu0 %1006 }
 0x361   : > { %v1009_v13 = vmul.f32 0.0078125, %v1007_v12  ;;  %v1466_v12 = vld [vmem:[%s4191_s10 + $0x18] sm:$0xff] }
 0x363   : > { %v1010_v14 = vsub.f32 %v4245_v27, %v1009_v13  ;;  %v1134_v27 = vld [vmem:[%s4177_s0 + $0x48] sm:$0xff]  ;;  %v2630_v13 = vpack.c.bf16 %v1466_v12, %v1465_v11  ;;  %s4692_s0 = sld [smem:[#allocation65_spill]] }
 0x364   : > { %v2591_v28 = vpack.c.bf16 %v1134_v27, %v1133_v25  ;;  %v2642_v25 = vpack.c.bf16 %v1474_v24, %v1473_v23  ;;  %v1475_v27 = vld [vmem:[%s4191_s10 + $0x60] sm:$0xff] }
 0x365   : > { %v1011_v15 = vmul.f32 %v1010_v14, %v1010_v14 }
 0x366   : > { %2592 = vmatpush3.bf16.msra.mxu0 %v2591_v28  ;;  %v1476_v28 = vld [vmem:[%s4191_s10 + $0x68] sm:$0xff] }
 0x367   : > { %1012 = vadd.xlane.f32.xlu0 %v1011_v15  ;;  %2593 = vmatprep.subr.bf16.mxu0 %v3485_v0  ;;  %v1468_v15 = vld [vmem:[%s4191_s10 + $0x28] sm:$0xff]  ;;  %v2645_v29 = vpack.c.bf16 %v1476_v28, %v1475_v27 }
 0x369   : > { %s4417_s16 = scalar_lea.hbm %s4692_s0, %s4409_s18 }
 0x36a   : > { %2595 = vmatpush3.bf16.msra.mxu0 %v2594_v36  ;;  %v1449_v36 = vld [vmem:[#allocation22] sm:$0xff] }
 0x36b   : > { %2596 = vmatprep.subr.bf16.mxu0 %v3485_v0 }
 0x36e   : > { %2598 = vmatpush3.bf16.msra.mxu0 %v2597_v40 }
 0x36f   : > { %2599 = vmatprep.subr.bf16.mxu0 %v3485_v0 }
 0x372   : > { %2601 = vmatpush3.bf16.msra.mxu0 %v2600_v43 }
 0x373   : > { %2445 = vmatprep.subr.mxu0 %v3487_v1 }
 0x3f4   : > { %v1013_v46 = vpop.xlane.xlu0 %1012 }
 0x3f5   : > { %v1014_v47 = vmul.f32 0.0078125, %v1013_v46 }
 0x3f7   : > { %v1015_v48 = vadd.f32 1e-05, %v1014_v47 }
 0x3f9   : > { %2868 = vrsqrt.f32 %v1015_v48 }
 0x403   : > { %v2869_v49 = vpop.eup %2868 }
 0x404   : > { %v1017_v50 = vmul.f32 %v2869_v49, %v1010_v14  ;;  %v1467_v14 = vld [vmem:[%s4191_s10 + $0x20] sm:$0xff]  ;;  %s3489_s10 = smov [#allocation24]  }
 0x405   : > { %v2633_v16 = vpack.c.bf16 %v1468_v15, %v1467_v14  ;;  %v1622_v49 = vld [vmem:[%s4194_s17] sm:$0xff]  ;;  %s3262_s25 = sshll.u32 %s3489_s10, 4  ;;  %s3263_s25 = int_to_ptr.vmem [resolvable:$false] %s3262_s25 }
 0x406   : > { %v1025_v52 = vmul.f32 %v2176_v26, %v1017_v50  ;;  %v1623_v26 = vld [vmem:[%s4194_s17 + $0x8] sm:$0xff]  ;;  %p3265_p10 = scmp.lt.s32.totalorder %s1753_s30, %s3263_s25 }
 0x408   : > { %v4332_v53 = vadd.f32 %v2177_v51, %v1025_v52  ;;  %v2651_v51 = vpack.c.bf16 %v1623_v26, %v1622_v49 }
 0x40a   : > { %2408 = vmatmul.mubr.f32.vlgmr.msra.gmra.mrb[2].mxu0 %v4332_v53  ;;  %2451 = vmatpush3.xpose.msra.mxu1 %v4332_v53  ;;  %1709 = vst [vmem:[%s909_s19] sm:$0xff] %v4332_v53 }
 0x40b   : > { %2447 = vmatprep.mubr.msk.f32.mxu0 %vm3486_vm0, %v3487_v1  ;;  %2490 = vmatprep.subr.mxu1 %v3487_v1 }
 0x40c   : > { %2446 = vmatpush3.xpose.msra.mxu0 %v1124_v59  ;;  %v1628_v59 = vld [vmem:[%s4194_s17 + $0x30] sm:$0xff] }
 0x40d   : > { %2626 = vmatprep.subr.bf16.mxu0 %v3485_v0  ;;  %2453 = vmatmul.mubr.f32.vlgmr.msra.gmra.mrb[4].mxu1 %v1305_v60  ;;  %v1629_v60 = vld [vmem:[%s4194_s17 + $0x38] sm:$0xff] }
 0x40e   : > { %2492 = vmatprep.mubr.msk.f32.mxu1 %vm3486_vm0, %v3487_v1  ;;  %v2660_v61 = vpack.c.bf16 %v1629_v60, %v1628_v59 }
 0x4dd   : > { %v1214_v63 = vpop.f32.mrb[2].mxu0 }
 0x4de   : > { %v1215_v2 = vadd.f32 %v2178_v62, %v1214_v63  ;;  %v2409_v3 = vpop.f32.mrb[3].mxu0  ;;  %v1631_v62 = vld [vmem:[%s4194_s17 + $0x48] sm:$0xff] }
 0x4df   : > { %v1633_v3 = vld [vmem:[%s4194_s17 + $0x58] sm:$0xff] }
 0x4e0   : > { %1219 = vrot.lane.b32.xlu1 %v1215_v2, %s3488_s6  ;;  %v1218_v7 = vmul.f32 %v1215_v2, %v918_v54  ;;  %v1445_v33 = vpop.f32.mrb[4].mxu1  ;;  %v1625_v54 = vld [vmem:[%s4194_s17 + $0x18] sm:$0xff]  ;;  %v1632_v2 = vld [vmem:[%s4194_s17 + $0x50] sm:$0xff] }
 0x4e1   : > { %v2454_v34 = vpop.f32.mrb[5].mxu1  ;;  %v2666_v4 = vpack.c.bf16 %v1633_v3, %v1632_v2 }
 0x552   : > { %v1220_v6 = vpop.permute.xlu1 %1219 }
 0x553   : > { %v1221_v8 = vmul.f32 %v1220_v6, %v919_v55  ;;  %v1635_v6 = vld [vmem:[%s4194_s17 + $0x68] sm:$0xff] }
 0x555   : > { %v1222_v10 = vadd.f32 %v1221_v8, %v1218_v7  ;;  %v2669_v7 = vpack.c.bf16 %v1635_v6, %v1634_v5  ;;  %v1636_v8 = vld [vmem:[%s4194_s17 + $0x70] sm:$0xff] }
 0x557   : > { %2448 = vmatmul.mubr.f32.vlgmr.msra.gmra.mrb[4].mxu0 %v1222_v10 }
 0x558   : > { %2628 = vmatpush3.bf16.msra.mxu0 %v2627_v9  ;;  %2487 = vmatprep.mubr.msk.f32.mxu0 %vm3486_vm0, %v3487_v1  ;;  %v1637_v9 = vld [vmem:[%s4194_s17 + $0x78] sm:$0xff] }
 0x559   : > { %2629 = vmatprep.subr.bf16.mxu0 %v3485_v0  ;;  %v2672_v10 = vpack.c.bf16 %v1637_v9, %v1636_v8 }
 0x55c   : > { %2631 = vmatpush3.bf16.msra.mxu0 %v2630_v13 }
 0x55d   : > { %2632 = vmatprep.subr.bf16.mxu0 %v3485_v0 }
 0x560   : > { %2634 = vmatpush3.bf16.msra.mxu0 %v2633_v16 }
 0x561   : > { %2635 = vmatprep.subr.bf16.mxu0 %v3485_v0 }
 0x564   : > { %2637 = vmatpush3.bf16.msra.mxu0 %v2636_v19 }
 0x565   : > { %2638 = vmatprep.subr.bf16.mxu0 %v3485_v0 }
 0x568   : > { %2640 = vmatpush3.bf16.msra.mxu0 %v2639_v22 }
 0x569   : > { %2641 = vmatprep.subr.bf16.mxu0 %v3485_v0 }
 0x56c   : > { %2643 = vmatpush3.bf16.msra.mxu0 %v2642_v25 }
 0x56d   : > { %2644 = vmatprep.subr.bf16.mxu0 %v3485_v0 }
 0x570   : > { %2646 = vmatpush3.bf16.msra.mxu0 %v2645_v29 }
 0x571   : > { %2647 = vmatprep.subr.bf16.mxu0 %v3485_v0 }
 0x574   : > { %2649 = vmatpush3.bf16.msra.mxu0 %v2648_v32 }
 0x577   : > { %2488 = vmatmul.mubr.f32.vlgmr.msra.gmra.mrb[6].mxu0 %v4332_v53  ;;  %v1624_v53 = vld [vmem:[%s4194_s17 + $0x10] sm:$0xff] }
 0x578   : > { %v2654_v55 = vpack.c.bf16 %v1625_v54, %v1624_v53 }
 0x62a   : > { %v1375_v35 = vpop.f32.mrb[4].mxu0 }
 0x62b   : > { %v1446_v37 = vadd.f32 %v1445_v33, %v1375_v35  ;;  %v2449_v38 = vpop.f32.mrb[5].mxu0 }
 0x62d   : > { %v1450_v39 = vadd.f32 %v1449_v36, %v1446_v37 }
 0x62f   : > { %v1452_v40 = vsel %vm1451_vm1, %v1450_v39, -inf }
 0x630   : > { %1453 = vmax.xlane.f32.xlu0 %v1452_v40 }
 0x64a   : > { %v1545_v41 = vpop.f32.mrb[6].mxu0 }
 0x64b   : > { %v2489_v42 = vpop.f32.mrb[7].mxu0  ;;  %2491 = vmatpush3.msra.mxu1 %v1545_v41 }
 0x64c   : > { %2650 = vmatprep.subr.bf16.mxu1 %v3485_v0 }
 0x6bd   : > { %v1454_v43 = vpop.xlane.xlu0 %1453 }
 0x6be   : > { %v1455_v44 = vsub.f32 %v1450_v39, %v1454_v43 }
 0x6c0   : > { %v1456_v45 = vmul.f32 1.442695, %v1455_v44 }
 0x6c2   : > { %2870 = vpow2.f32 %v1456_v45 }
 0x6cc   : > { %v2871_v46 = vpop.eup %2870 }
 0x6cd   : > { %v1458_v47 = vsel %vm1451_vm1, %v2871_v46, 0.0 }
 0x6ce   : > { %1459 = vadd.xlane.f32.xlu1 %v1458_v47 }
 0x75b   : > { %v1460_v48 = vpop.xlane.xlu1 %1459 }
 0x75c   : > { %2872 = vrcp.f32 %v1460_v48 }
 0x766   : > { %v2873_v50 = vpop.eup %2872 }
 0x767   : > { %v1462_v52 = vmul.f32 %v2873_v50, %v2871_v46 }
 0x769   : > { %2493 = vmatmul.mubr.msk.f32.vlgmr.msra.gmra.mrb[6].mxu1 %vm1451_vm1, %v1462_v52 }
 0x76a   : > { %2652 = vmatpush3.bf16.msra.mxu1 %v2651_v51  ;;  %2527 = vmatprep.mubr.msk.f32.mxu1 %vm3486_vm0, %v3487_v1  ;;  %v1630_v1 = vld [vmem:[%s4194_s17 + $0x40] sm:$0xff]  ;;  %s3264_s17 = scalar_lea.vmem %s3263_s25, 256 }
 0x76b   : > { %2653 = vmatprep.subr.bf16.mxu1 %v3485_v0  ;;  %v2663_v63 = vpack.c.bf16 %v1631_v62, %v1630_v1  ;;  %p3266_p13 = scmp.lt.s32.totalorder %s3264_s17, %s3258_s11 }
 0x76d   : > { %p3267_p3 = por %p3266_p13, %p3265_p10 }
 0x76e   : > { %2655 = vmatpush3.bf16.msra.mxu1 %v2654_v55 }
 0x76f   : > { %2656 = vmatprep.subr.bf16.mxu1 %v3485_v0  ;;  %p3268_p0 = pnand %p3267_p3, %p3261_p4 }
 0x772   : > { %2658 = vmatpush3.bf16.msra.mxu1 %v2657_v58 }
 0x773   : > { %2659 = vmatprep.subr.bf16.mxu1 %v3485_v0 }
 0x776   : > { %2661 = vmatpush3.bf16.msra.mxu1 %v2660_v61 }
 0x777   : > { %2662 = vmatprep.subr.bf16.mxu1 %v3485_v0 }
 0x77a   : > { %2664 = vmatpush3.bf16.msra.mxu1 %v2663_v63 }
 0x77b   : > { %2665 = vmatprep.subr.bf16.mxu1 %v3485_v0 }
 0x77e   : > { %2667 = vmatpush3.bf16.msra.mxu1 %v2666_v4 }
 0x77f   : > { %2668 = vmatprep.subr.bf16.mxu1 %v3485_v0 }
 0x782   : > { %2670 = vmatpush3.bf16.msra.mxu1 %v2669_v7 }
 0x783   : > { %2671 = vmatprep.subr.bf16.mxu1 %v3485_v0 }
 0x786   : > { %2673 = vmatpush3.bf16.msra.mxu1 %v2672_v10 }
 0x83c   : > { %v1618_v11 = vpop.f32.mrb[6].mxu1 }
 0x83d   : > { %v2494_v12 = vpop.f32.mrb[7].mxu1  ;;  %2528 = vmatmul.mubr.f32.vlgmr.msra.gmra.mrb[8].mxu1 %v1618_v11 }
 0x83e   : > { %3271 = shalt.err (!%p3268_p0)
}
 0x83f   : > { %s3272_s6 = scalar_lea.hbm %s4417_s16, 128  ;;  %s3276_s7 = scalar_lea.hbm %s4692_s0, 512 }
 0x840   : > { %p3273_p1 = scmp.ne.s32.totalorder %s4417_s16, %s3272_s6  ;;  %p3277_p2 = scmp.lt.u32.totalorder %s4417_s16, %s4692_s0 }
 0x841   : > { %p3278_p8 = scmp.lt.u32.totalorder %s3276_s7, %s3272_s6  ;;  %p3280_p6 = scmp.lt.u32.totalorder %s3272_s6, %s4417_s16 }
 0x842   : > { %p3274_p12 = pnand %p3273_p1, %p4693_p7 }
 0x843   : > { %p3279_p9 = por %p3278_p8, %p3277_p2 }
 0x844   : > { %p3275_p11 = pneg %p3274_p12 }
 0x845   : > { %p3281_p5 = por %p3280_p6, %p3279_p9 }
 0x847   : > { %p3282_p4 = pnand %p3281_p5, %p3275_p11 }
 0x849   : > { %3285 = shalt.err (!%p3282_p4)
}
 0x84a   : > { %2707 = dma.vmem_to_hbm [thread:$0]  (%p4693_p7), %s1753_s30, 128, %s4417_s16, %s1717_s5  }
 0x84b   : > { %s4694_s11 = sld [smem:[#allocation66_spill]]  ;;  %s1767_s25 = sshll.u32 %s916_s12, 4  ;;  %s1768_s25 = int_to_ptr.vmem [resolvable:$true] %s1767_s25 }
 0x84c   : > { %s3286_s17 = scalar_lea.vmem %s1768_s25, 128  ;;  %s3490_s6 = smov [#allocation26]  }
 0x84d   : > { %p3287_p10 = scmp.ne.s32.totalorder %s1768_s25, %s3286_s17  ;;  %s3290_s19 = sshll.u32 %s3490_s6, 4  ;;  %s3291_s19 = int_to_ptr.vmem [resolvable:$false] %s3290_s19 }
 0x84e   : > { %s3292_s27 = scalar_lea.vmem %s3291_s19, 256  ;;  %p3293_p0 = scmp.lt.s32.totalorder %s1768_s25, %s3291_s19 }
 0x84f   : > { %p3288_p13 = pnand %p3287_p10, %p4693_p7  ;;  %p3294_p1 = scmp.lt.s32.totalorder %s3292_s27, %s3286_s17 }
 0x851   : > { %s4443_s10 = scalar_lea.hbm %s4694_s11, %s4409_s18  ;;  %p3289_p3 = pneg %p3288_p13 }
 0x852   : > { %p3295_p12 = por %p3294_p1, %p3293_p0 }
 0x854   : > { %p3296_p11 = pnand %p3295_p12, %p3289_p3 }
 0x856   : > { %3299 = shalt.err (!%p3296_p11)
}
 0x857   : > { %s3300_s12 = scalar_lea.hbm %s4443_s10, 128  ;;  %s3304_s7 = scalar_lea.hbm %s4694_s11, 512 }
 0x858   : > { %p3301_p2 = scmp.ne.s32.totalorder %s4443_s10, %s3300_s12  ;;  %p3305_p6 = scmp.lt.u32.totalorder %s4443_s10, %s4694_s11 }
 0x859   : > { %p3306_p5 = scmp.lt.u32.totalorder %s3304_s7, %s3300_s12  ;;  %p3308_p10 = scmp.lt.u32.totalorder %s3300_s12, %s4443_s10 }
 0x85a   : > { %p3302_p8 = pnand %p3301_p2, %p4693_p7 }
 0x85b   : > { %p3307_p4 = por %p3306_p5, %p3305_p6 }
 0x85c   : > { %p3303_p9 = pneg %p3302_p8 }
 0x85d   : > { %p3309_p13 = por %p3308_p10, %p3307_p4 }
 0x85f   : > { %p3310_p3 = pnand %p3309_p13, %p3303_p9 }
 0x861   : > { %3313 = shalt.err (!%p3310_p3)
}
 0x862   : > { %2708 = dma.vmem_to_hbm [thread:$0]  (%p4693_p7), %s1768_s25, 128, %s4443_s10, %s1717_s5  }
 0x863   : > { %s902_s24 = scalar_lea.vmem [#allocation23], %s4145_s26  ;;  %s4695_s19 = sld [smem:[#allocation64_spill]] }
 0x864   : > { %s1737_s8 = sshll.u32 %s902_s24, 4  ;;  %s1712_s13 = scalar_lea.sflag [#allocation4], %s4142_s20  ;;  %s4467_s8 = int_to_ptr.vmem [resolvable:$true] %s1737_s8 }
 0x865   : > { %s3314_s30 = scalar_lea.vmem %s4467_s8, 128  ;;  %s3491_s26 = smov [#allocation23]  }
 0x866   : > { %p3315_p0 = scmp.ne.s32.totalorder %s4467_s8, %s3314_s30  ;;  %s3318_s5 = sshll.u32 %s3491_s26, 4  ;;  %s3319_s5 = int_to_ptr.vmem [resolvable:$false] %s3318_s5 }
 0x867   : > { %s3320_s10 = scalar_lea.vmem %s3319_s5, 256  ;;  %p3321_p11 = scmp.lt.s32.totalorder %s4467_s8, %s3319_s5 }
 0x868   : > { %p3316_p1 = pnand %p3315_p0, %p4693_p7  ;;  %p3322_p2 = scmp.lt.s32.totalorder %s3320_s10, %s3314_s30 }
 0x869   : > { %s4696_s12 = smov %s4695_s19  ;;  %s4473_s27 = scalar_lea.hbm %s4695_s19, %s4409_s18 }
 0x86a   : > { %p3317_p12 = pneg %p3316_p1  ;;  %p3323_p8 = por %p3322_p2, %p3321_p11 }
 0x86c   : > { %p3324_p9 = pnand %p3323_p8, %p3317_p12 }
 0x910   : > { %v1704_v0 = vpop.f32.mrb[8].mxu1 }
 0x911   : > { %1708 = vst [vmem:[%s902_s24] sm:$0xff] %v1704_v0  ;;  %v2529_v13 = vpop.f32.mrb[9].mxu1 }
 0x912   : > { %3327 = shalt.err (!%p3324_p9)
}
 0x913   : > { %s3328_s20 = scalar_lea.hbm %s4473_s27, 128  ;;  %s3332_s16 = scalar_lea.hbm %s4696_s12, 512 }
 0x914   : > { %p3329_p6 = scmp.ne.s32.totalorder %s4473_s27, %s3328_s20  ;;  %p3333_p10 = scmp.lt.u32.totalorder %s4473_s27, %s4696_s12 }
 0x915   : > { %p3334_p13 = scmp.lt.u32.totalorder %s3332_s16, %s3328_s20  ;;  %p3336_p0 = scmp.lt.u32.totalorder %s3328_s20, %s4473_s27 }
 0x916   : > { %p3330_p5 = pnand %p3329_p6, %p4693_p7 }
 0x917   : > { %p3335_p3 = por %p3334_p13, %p3333_p10 }
 0x918   : > { %p3331_p4 = pneg %p3330_p5 }
 0x919   : > { %p3337_p1 = por %p3336_p0, %p3335_p3 }
 0x91b   : > { %p3338_p12 = pnand %p3337_p1, %p3331_p4 }
 0x91d   : > { %3341 = shalt.err (!%p3338_p12)
}
 0x91e   : > { %2706 = dma.vmem_to_hbm [thread:$0]  (%p4693_p7), %s4467_s8, 128, %s4473_s27, %s1712_s13  }
 0x91f PF: > { %s4697_s14 = sld [smem:[#allocation39_spill]]  ;;  %p2770_p11 = scmp.ge.s32.totalorder %s3468_s28, 2 }
 0x920   : > { %p4698_p2 = scmp.ne.s32.totalorder %s4660_s29, 0 }
 0x922   : > { %p2754_p8 = pnand %p2770_p11, %p4698_p2 }
 0x925   : > { %s1779_s24 = sand.u32 1, %s4697_s14  }
 0x926   : > { %s1780_s17 = scalar_lea.sflag [#allocation4], %s1779_s24 }
 0x927   : > { %3419 = dma.done.wait (!%p2754_p8), %s1780_s17, 128  }
 0x928   : > { %3421 = vsyncadd (!%p2754_p8), %s1780_s17, 4294967168  ;;  %s4699_s6 = sadd.s32 4294967294, %s3468_s28  }
 0x929   : > { %s1788_s19 = sand.u32 1, %s4699_s6  }
 0x92a   : > { %s1789_s30 = scalar_lea.sflag [#allocation25], %s1788_s19 }
 0x92b   : > { %3423 = dma.done.wait (!%p2754_p8), %s1789_s30, 256  }
 0x92c   : > { %3425 = vsyncadd (!%p2754_p8), %s1789_s30, 4294967040  ;;  %s51_s28 = sadd.s32 1, %s3468_s28   ;;  %s4700_s18 = sld [smem:[#allocation37_spill]] }
 0x92d   : > { %p48_p7 = scmp.ge.s32.totalorder %s51_s28, 6   ;;  %s4701_s19 = sld [smem:[#allocation38_spill]] }
 0x92e   : > { %s4702_s24 = sld [smem:[#allocation42_spill]]  ;;  %s4703_s25 = sld [smem:[#allocation43_spill]] }
 0x92f   : > { %s4704_s26 = sld [smem:[#allocation47_spill]]  ;;  %s4705_s27 = sld [smem:[#allocation48_spill]] }
 0x930   : > { %s4706_s20 = smov %s4717_s9  ;;  %s4707_s21 = smov %s3444_s22 }
 0x931   : > { %s4708_s22 = smov %s3448_s23  ;;  %s4709_s23 = smov %s3930_s1 }
 0x932   :  { %50 = sbr.rel (!%p48_p7) target bundleno = 39 (0x27), region = 270 }
 0x939   :  { %1803 = vsyncpa [#allocation3], 1 }
 0x93a   :  { %1805 = vsyncpa [#allocation3 + $0x1], 1 }
 0x93b   :  { %1806 = vsyncpa [#allocation6], 1 }
 0x93c   :  { %1808 = vsyncpa [#allocation6 + $0x1], 1 }
 0x93d   :  { %1809 = vsyncpa [#allocation9], 1 }
 0x93e   :  { %1811 = vsyncpa [#allocation9 + $0x1], 1 }
 0x93f   :  { %1812 = vsyncpa [#allocation12], 1 }
 0x940   :  { %1814 = vsyncpa [#allocation12 + $0x1], 1 }
 0x941   :  { %1815 = vsyncpa [#allocation15], 1 }
 0x942   :  { %1817 = vsyncpa [#allocation15 + $0x1], 1 }
 0x943   :  { %1818 = vsyncpa [#allocation18], 1 }
 0x944   :  { %1820 = vsyncpa [#allocation18 + $0x1], 1 }
 0x945   :  { %1821 = vsyncpa [#allocation21], 1 }
 0x946   :  { %1822 = vsyncpa [#allocation4], 1 }
 0x947   :  { %1824 = vsyncpa [#allocation4 + $0x1], 1 }
 0x948   :  { %1825 = vsyncpa [#allocation25], 1 }
 0x949   :  { %1827 = vsyncpa [#allocation25 + $0x1], 1 }

</bundles_post_ra>
